<compile_context>
chip_gen: v6e
topology: v6e:2x2x1
jax: 0.10.0
libtpu: 0.0.40
codegen_flags: <defaults>
</compile_context>

<pallas_src>
import functools

import jax
import jax.numpy as jnp
from jax.experimental import pallas as pl
from jax.experimental.pallas import tpu as pltpu

NEG_SLOPE = 0.2  # LeakyReLU slope used by PyG GATConv


# ---------------------------------------------------------------------------
# Shared math helpers (used inside the kernels and by the pure-JAX reference).
# ---------------------------------------------------------------------------
def _recip_approx(s):
    return pl.reciprocal(s, approx=True)


def _attention(alpha_dst, alpha_src, adj, recip):
    """Masked, unnormalized attention weights for all heads at once.

    alpha_dst: [M, H] destination-node logits (this row tile)
    alpha_src: [N, H] source-node logits (ALL source nodes)
    adj:       [M, N] 0/1 edge mask (adj[i, j] = 1 iff edge j -> i), bf16 ok
    Returns (p, inv_s): p     = exp(leaky_relu(e) - rowmax) * adj   [H, M, N]
                        inv_s = 1 / rowsum(p)                       [H, M, 1]
    Normalization is deferred to after the aggregation matmul.
    """
    e = alpha_dst.T[:, :, None] + alpha_src.T[:, None, :]       # one broadcast-add
    e = jnp.where(e > 0, e, NEG_SLOPE * e)                       # LeakyReLU
    m = jnp.max(e, axis=-1, keepdims=True)                       # exp(e - m) <= 1
    p = jnp.exp(e - m) * adj[None, :, :].astype(jnp.float32)     # multiplicative mask
    s = jnp.sum(p, axis=-1, keepdims=True)                       # > 0 (self loops)
    return p, recip(s)


def _one_head_agg(p_h, inv_h, xw_cols):
    """sum_j softmax(e)_ij * xw_j for one head: [M, N] x [N, D] -> [M, D]."""
    agg = jnp.dot(p_h.astype(jnp.bfloat16), xw_cols.astype(jnp.bfloat16),
                  preferred_element_type=jnp.float32)
    return agg * inv_h                                           # deferred normalization


def _multi_head_agg(p, inv_s, xw, heads, dim):
    """Concatenated per-head aggregation -> [M, heads*dim] (functional form)."""
    outs = [_one_head_agg(p[h], inv_s[h], xw[:, h * dim:(h + 1) * dim])
            for h in range(heads)]
    return outs[0] if heads == 1 else jnp.concatenate(outs, axis=1)


def _elu(x):
    return jnp.where(x > 0, x, jnp.exp(jnp.minimum(x, 0.0)) - 1.0)


def _log_softmax(x):
    m = jnp.max(x, axis=1, keepdims=True)
    z = x - m
    return z - jnp.log(jnp.sum(jnp.exp(z), axis=1, keepdims=True))


# ---------------------------------------------------------------------------
# Pure-JAX reference (identical math; exact reciprocal instead of EUP approx).
# ---------------------------------------------------------------------------
def gat_reference(x, adj, w1, a_src1, a_dst1, b1, w2, a_src2, a_dst2, b2,
                  heads1, dim1, heads2, dim2):
    f32, bf16 = jnp.float32, jnp.bfloat16
    recip = lambda s: 1.0 / s
    xw1 = jnp.dot(x.astype(bf16), w1.astype(bf16), preferred_element_type=f32)
    p1, inv1 = _attention(jnp.dot(xw1, a_dst1, preferred_element_type=f32),
                          jnp.dot(xw1, a_src1, preferred_element_type=f32),
                          adj, recip)
    h1 = _elu(_multi_head_agg(p1, inv1, xw1, heads1, dim1) + b1)
    xw2 = jnp.dot(h1.astype(bf16), w2.astype(bf16), preferred_element_type=f32)
    p2, inv2 = _attention(jnp.dot(xw2, a_dst2, preferred_element_type=f32),
                          jnp.dot(xw2, a_src2, preferred_element_type=f32),
                          adj, recip)
    h2 = _multi_head_agg(p2, inv2, xw2, heads2, dim2) + b2
    return _log_softmax(h2)


# ---------------------------------------------------------------------------
# Path A: single fused, gridless kernel (whole toy graph resident in VMEM).
# ---------------------------------------------------------------------------
def gat_fused_kernel(x_ref, adj_ref, w1_ref, as1_ref, ad1_ref, b1_ref,
                     w2_ref, as2_ref, ad2_ref, b2_ref, out_ref, h1_ref,
                     *, heads1, dim1, heads2, dim2):
    # TODO(synk): F.dropout(p=0.6) is identity in eval mode; training-mode
    # dropout masks are not implemented.
    f32, bf16 = jnp.float32, jnp.bfloat16
    adj = adj_ref[...]

    # conv1: GATConv(F -> dim1, heads=heads1, concat=True) + ELU
    xw1 = jnp.dot(x_ref[...].astype(bf16), w1_ref[...].astype(bf16),
                  preferred_element_type=f32)                       # [N, H1*D1]
    p1, inv1 = _attention(jnp.dot(xw1, ad1_ref[...], preferred_element_type=f32),
                          jnp.dot(xw1, as1_ref[...], preferred_element_type=f32),
                          adj, _recip_approx)
    b1 = b1_ref[...]
    for h in range(heads1):                    # column-slice stores (layout only)
        sl = slice(h * dim1, (h + 1) * dim1)
        h1_ref[:, sl] = _elu(_one_head_agg(p1[h], inv1[h], xw1[:, sl]) + b1[:, sl])

    # conv2: single full-depth [N, H1*D1] @ [H1*D1, C] projection
    xw2 = jnp.dot(h1_ref[...].astype(bf16), w2_ref[...].astype(bf16),
                  preferred_element_type=f32)                       # [N, C]
    p2, inv2 = _attention(jnp.dot(xw2, ad2_ref[...], preferred_element_type=f32),
                          jnp.dot(xw2, as2_ref[...], preferred_element_type=f32),
                          adj, _recip_approx)
    h2 = _multi_head_agg(p2, inv2, xw2, heads2, dim2) + b2_ref[...]
    out_ref[...] = _log_softmax(h2)


def gat_net_forward_fused(x, adj, w1, a_src1, a_dst1, b1, w2, a_src2, a_dst2, b2,
                          *, heads1, dim1, heads2, dim2):
    n = x.shape[0]
    c = heads2 * dim2
    args = (x, adj, w1, a_src1, a_dst1, b1, w2, a_src2, a_dst2, b2)
    kernel = functools.partial(gat_fused_kernel, heads1=heads1, dim1=dim1,
                               heads2=heads2, dim2=dim2)
    vmem = pltpu.MemorySpace.VMEM
    return pl.pallas_call(
        kernel,
        out_shape=jax.ShapeDtypeStruct((n, c), jnp.float32),
        in_specs=[pl.BlockSpec(memory_space=vmem) for _ in args],
        out_specs=pl.BlockSpec(memory_space=vmem),
        scratch_shapes=[pltpu.VMEM((n, heads1 * dim1), jnp.float32)],
    )(*args)


# ---------------------------------------------------------------------------
# Path B: row-tiled (destination nodes) 3-pass pipeline for larger graphs.
#   pass 1: per-node projection xw1 = x@w1 and attention logits
#   pass 2: conv1 attention + aggregation + ELU, fused with conv2's input
#           projection + attention logits (epilogue)
#   pass 3: conv2 attention + aggregation + bias + log_softmax
# Layers are separate pallas_calls because each destination-row tile needs
# xw / alpha_src of ALL source nodes from the previous layer.
# ---------------------------------------------------------------------------
def _proj1_kernel(x_ref, w1_ref, as1_ref, ad1_ref, xw1_ref, asrc1_ref, adst1_ref):
    f32, bf16 = jnp.float32, jnp.bfloat16
    xw1 = jnp.dot(x_ref[...].astype(bf16), w1_ref[...].astype(bf16),
                  preferred_element_type=f32)
    xw1_ref[...] = xw1
    asrc1_ref[...] = jnp.dot(xw1, as1_ref[...], preferred_element_type=f32)
    adst1_ref[...] = jnp.dot(xw1, ad1_ref[...], preferred_element_type=f32)


def _conv1_tiled_kernel(adst1_ref, adj_ref, asrc1_ref, xw1_ref, b1_ref,
                        w2_ref, as2_ref, ad2_ref,
                        xw2_ref, asrc2_ref, adst2_ref, h1_ref, *, heads1, dim1):
    f32, bf16 = jnp.float32, jnp.bfloat16
    xw1 = xw1_ref[...]
    p1, inv1 = _attention(adst1_ref[...], asrc1_ref[...], adj_ref[...], _recip_approx)
    b1 = b1_ref[...]
    for h in range(heads1):
        sl = slice(h * dim1, (h + 1) * dim1)
        h1_ref[:, sl] = _elu(_one_head_agg(p1[h], inv1[h], xw1[:, sl]) + b1[:, sl])
    xw2 = jnp.dot(h1_ref[...].astype(bf16), w2_ref[...].astype(bf16),
                  preferred_element_type=f32)
    xw2_ref[...] = xw2
    asrc2_ref[...] = jnp.dot(xw2, as2_ref[...], preferred_element_type=f32)
    adst2_ref[...] = jnp.dot(xw2, ad2_ref[...], preferred_element_type=f32)


def _conv2_tiled_kernel(adst2_ref, adj_ref, asrc2_ref, xw2_ref, b2_ref, out_ref,
                        *, heads2, dim2):
    p2, inv2 = _attention(adst2_ref[...], asrc2_ref[...], adj_ref[...], _recip_approx)
    h2 = _multi_head_agg(p2, inv2, xw2_ref[...], heads2, dim2) + b2_ref[...]
    out_ref[...] = _log_softmax(h2)


def _vmem_limit_bytes():
    # Generation-aware scoped-VMEM budget (~100 MiB on v5e/v6e, ~54 MiB on v7x).
    try:
        cap = pltpu.get_tpu_info().vmem_capacity_bytes
        return min(int(cap * 0.85), 100 * 1024 * 1024)
    except Exception:
        return None


def _pick_tile_rows(n_nodes, heads):
    """Largest destination-row tile whose [H, TM, N] score/prob buffers fit VMEM."""
    try:
        cap = pltpu.get_tpu_info().vmem_capacity_bytes
    except Exception:
        cap = 64 * 1024 * 1024
    budget = cap // 2                      # leave room for double-buffered tiles
    tm = min(512, n_nodes)
    while tm > 8 and (2 * heads * tm * n_nodes * 4 > budget or n_nodes % tm != 0):
        tm //= 2
    return max(tm, 8)


def gat_net_forward_tiled(x, adj, w1, a_src1, a_dst1, b1, w2, a_src2, a_dst2, b2,
                          *, heads1, dim1, heads2, dim2, tile_rows=None):
    n, f = x.shape
    d1 = heads1 * dim1
    c = heads2 * dim2
    tm = tile_rows if tile_rows is not None else _pick_tile_rows(n, heads1)
    assert n % tm == 0, (n, tm)
    grid = (n // tm,)
    f32 = jnp.float32
    cparams = pltpu.CompilerParams(
        dimension_semantics=("parallel",),       # shards row tiles across TCs (v7x)
        vmem_limit_bytes=_vmem_limit_bytes())
    row = lambda i: (i, 0)                       # this step's destination-row tile
    full = lambda i: (0, 0)                      # whole (small) array, resident

    # ---- pass 1: projection ------------------------------------------------
    xw1, asrc1, adst1 = pl.pallas_call(
        _proj1_kernel,
        grid=grid,
        in_specs=[pl.BlockSpec((tm, f), row),
                  pl.BlockSpec((f, d1), full),
                  pl.BlockSpec((d1, heads1), full),
                  pl.BlockSpec((d1, heads1), full)],
        out_specs=[pl.BlockSpec((tm, d1), row),
                   pl.BlockSpec((tm, heads1), row),
                   pl.BlockSpec((tm, heads1), row)],
        out_shape=(jax.ShapeDtypeStruct((n, d1), f32),
                   jax.ShapeDtypeStruct((n, heads1), f32),
                   jax.ShapeDtypeStruct((n, heads1), f32)),
        compiler_params=cparams,
    )(x, w1, a_src1, a_dst1)

    # ---- pass 2: conv1 (+ ELU) fused with conv2 input projection -----------
    xw2, asrc2, adst2 = pl.pallas_call(
        functools.partial(_conv1_tiled_kernel, heads1=heads1, dim1=dim1),
        grid=grid,
        in_specs=[pl.BlockSpec((tm, heads1), row),   # alpha_dst1 (row tile)
                  pl.BlockSpec((tm, n), row),        # adj rows (bf16)
                  pl.BlockSpec((n, heads1), full),   # alpha_src1 (all sources)
                  pl.BlockSpec((n, d1), full),       # xw1 (all sources)
                  pl.BlockSpec((1, d1), full),       # b1
                  pl.BlockSpec((d1, c), full),       # w2
                  pl.BlockSpec((c, heads2), full),   # a_src2
                  pl.BlockSpec((c, heads2), full)],  # a_dst2
        out_specs=[pl.BlockSpec((tm, c), row),
                   pl.BlockSpec((tm, heads2), row),
                   pl.BlockSpec((tm, heads2), row)],
        out_shape=(jax.ShapeDtypeStruct((n, c), f32),
                   jax.ShapeDtypeStruct((n, heads2), f32),
                   jax.ShapeDtypeStruct((n, heads2), f32)),
        scratch_shapes=[pltpu.VMEM((tm, d1), f32)],
        compiler_params=cparams,
    )(adst1, adj, asrc1, xw1, b1, w2, a_src2, a_dst2)

    # ---- pass 3: conv2 + log_softmax ---------------------------------------
    return pl.pallas_call(
        functools.partial(_conv2_tiled_kernel, heads2=heads2, dim2=dim2),
        grid=grid,
        in_specs=[pl.BlockSpec((tm, heads2), row),
                  pl.BlockSpec((tm, n), row),
                  pl.BlockSpec((n, heads2), full),
                  pl.BlockSpec((n, c), full),
                  pl.BlockSpec((1, c), full)],
        out_specs=pl.BlockSpec((tm, c), row),
        out_shape=jax.ShapeDtypeStruct((n, c), f32),
        compiler_params=cparams,
    )(adst2, adj, asrc2, xw2, b2)


def _block_diag_att(a):
    """[H, D] per-head attention vectors -> block-diagonal [H*D, H] matrix."""
    h, d = a.shape
    eye = jnp.eye(h, dtype=a.dtype)
    return (a[:, :, None] * eye[:, None, :]).reshape(h * d, h)


if __name__ == "__main__":
    HEADS1, DIM1 = 8, 8          # conv1: GATConv(F, 8, heads=8)
    C = 4                        # num classes
    HEADS2, DIM2 = 1, C          # conv2: GATConv(64, C, heads=1, concat=True)
    F_IN = 16

    key = jax.random.PRNGKey(0)
    ks = jax.random.split(key, 12)

    # parameters (shared by both test graphs); weight matrices in bf16 (MXU)
    w1 = (jax.random.normal(ks[2], (F_IN, HEADS1 * DIM1), jnp.float32)
          * 0.3).astype(jnp.bfloat16)
    att_src1 = jax.random.normal(ks[3], (HEADS1, DIM1), jnp.float32) * 0.3
    att_dst1 = jax.random.normal(ks[4], (HEADS1, DIM1), jnp.float32) * 0.3
    b1 = jax.random.normal(ks[5], (1, HEADS1 * DIM1), jnp.float32) * 0.1
    w2 = (jax.random.normal(ks[6], (HEADS1 * DIM1, HEADS2 * DIM2), jnp.float32)
          * 0.3).astype(jnp.bfloat16)
    att_src2 = jax.random.normal(ks[7], (HEADS2, DIM2), jnp.float32) * 0.3
    att_dst2 = jax.random.normal(ks[8], (HEADS2, DIM2), jnp.float32) * 0.3
    b2 = jax.random.normal(ks[9], (1, HEADS2 * DIM2), jnp.float32) * 0.1

    a_src1 = _block_diag_att(att_src1)   # [64, 8]
    a_dst1 = _block_diag_att(att_dst1)   # [64, 8]
    a_src2 = _block_diag_att(att_src2)   # [4, 1]
    a_dst2 = _block_diag_att(att_dst2)   # [4, 1]
    params = (w1, a_src1, a_dst1, b1, w2, a_src2, a_dst2, b2)

    def make_graph(key_x, key_a, n):
        xg = jax.random.normal(key_x, (n, F_IN), jnp.float32)
        ag = (jax.random.uniform(key_a, (n, n)) < 0.3).astype(jnp.float32)
        ag = jnp.maximum(ag, jnp.eye(n, dtype=jnp.float32))   # PyG adds self loops
        return xg, ag.astype(jnp.bfloat16)                    # 0/1 exact in bf16

    def check(out, ref):
        assert bool(jnp.all(jnp.isfinite(out)))
        err = float(jnp.max(jnp.abs(out - ref)))
        assert err < 5e-2, err

    # ---- toy graph: fused gridless kernel ----------------------------------
    x_s, adj_s = make_graph(ks[0], ks[1], 32)
    out_s = jax.block_until_ready(gat_net_forward_fused(
        x_s, adj_s, *params, heads1=HEADS1, dim1=DIM1, heads2=HEADS2, dim2=DIM2))
    ref_s = jax.block_until_ready(gat_reference(
        x_s, adj_s, *params, HEADS1, DIM1, HEADS2, DIM2))
    assert out_s.shape == (32, C)
    check(out_s, ref_s)

    # ---- bigger graph: row-tiled 3-pass pipeline (grid of 2 parallel tiles) -
    x_l, adj_l = make_graph(ks[10], ks[11], 256)
    out_l = jax.block_until_ready(gat_net_forward_tiled(
        x_l, adj_l, *params, heads1=HEADS1, dim1=DIM1, heads2=HEADS2, dim2=DIM2,
        tile_rows=128))
    ref_l = jax.block_until_ready(gat_reference(
        x_l, adj_l, *params, HEADS1, DIM1, HEADS2, DIM2))
    assert out_l.shape == (256, C)
    check(out_l, ref_l)

    print("KERNEL_OK")
</pallas_src>

<mosaic_0001>
module attributes {stable_mosaic.version = 11 : i64} {
  func.func @gat_fused_kernel(%arg0: memref<32x16xf32, #tpu.memory_space<vmem>>, %arg1: memref<32x32xbf16, #tpu.memory_space<vmem>>, %arg2: memref<16x64xbf16, #tpu.memory_space<vmem>>, %arg3: memref<64x8xf32, #tpu.memory_space<vmem>>, %arg4: memref<64x8xf32, #tpu.memory_space<vmem>>, %arg5: memref<1x64xf32, #tpu.memory_space<vmem>>, %arg6: memref<64x4xbf16, #tpu.memory_space<vmem>>, %arg7: memref<4x1xf32, #tpu.memory_space<vmem>>, %arg8: memref<4x1xf32, #tpu.memory_space<vmem>>, %arg9: memref<1x4xf32, #tpu.memory_space<vmem>>, %arg10: memref<32x4xf32, #tpu.memory_space<vmem>>, %arg11: memref<32x64xf32, #tpu.memory_space<vmem>>) attributes {dimension_semantics = [], scalar_prefetch = 0 : i64, scratch_operands = 1 : i64, tpu.core_type = #tpu.core_type<tc>} {
    %c0 = arith.constant 0 : index
    %c0_0 = arith.constant 0 : index
    %0 = vector.load %arg1[%c0, %c0_0] : memref<32x32xbf16, #tpu.memory_space<vmem>>, vector<32x32xbf16>
    %c0_1 = arith.constant 0 : index
    %c0_2 = arith.constant 0 : index
    %1 = vector.load %arg0[%c0_1, %c0_2] : memref<32x16xf32, #tpu.memory_space<vmem>>, vector<32x16xf32>
    %2 = arith.truncf %1 : vector<32x16xf32> to vector<32x16xbf16>
    %c0_3 = arith.constant 0 : index
    %c0_4 = arith.constant 0 : index
    %3 = vector.load %arg2[%c0_3, %c0_4] : memref<16x64xbf16, #tpu.memory_space<vmem>>, vector<16x64xbf16>
    %cst = arith.constant dense<0.000000e+00> : vector<32x64xf32>
    %4 = tpu.matmul %2, %3, %cst {dimension_numbers = #tpu.dot_dimension_numbers<[1], [0], [0], [1], [0, 0, 1, 1], [], []>} : vector<32x16xbf16>, vector<16x64xbf16>, vector<32x64xf32> -> vector<32x64xf32>
    %c0_5 = arith.constant 0 : index
    %c0_6 = arith.constant 0 : index
    %5 = vector.load %arg4[%c0_5, %c0_6] : memref<64x8xf32, #tpu.memory_space<vmem>>, vector<64x8xf32>
    %cst_7 = arith.constant dense<0.000000e+00> : vector<32x8xf32>
    %6 = tpu.matmul %4, %5, %cst_7 {dimension_numbers = #tpu.dot_dimension_numbers<[1], [0], [0], [1], [0, 0, 1, 1], [], []>} : vector<32x64xf32>, vector<64x8xf32>, vector<32x8xf32> -> vector<32x8xf32>
    %c0_8 = arith.constant 0 : index
    %c0_9 = arith.constant 0 : index
    %7 = vector.load %arg3[%c0_8, %c0_9] : memref<64x8xf32, #tpu.memory_space<vmem>>, vector<64x8xf32>
    %cst_10 = arith.constant dense<0.000000e+00> : vector<32x8xf32>
    %8 = tpu.matmul %4, %7, %cst_10 {dimension_numbers = #tpu.dot_dimension_numbers<[1], [0], [0], [1], [0, 0, 1, 1], [], []>} : vector<32x64xf32>, vector<64x8xf32>, vector<32x8xf32> -> vector<32x8xf32>
    %9 = tpu.transpose %6, [1, 0] : vector<32x8xf32> -> vector<8x32xf32>
    %10 = vector.shape_cast %9 : vector<8x32xf32> to vector<8x32x1xf32>
    %11 = tpu.transpose %8, [1, 0] : vector<32x8xf32> -> vector<8x32xf32>
    %12 = vector.shape_cast %11 : vector<8x32xf32> to vector<8x1x32xf32>
    %13 = vector.broadcast %10 : vector<8x32x1xf32> to vector<8x32x32xf32>
    %14 = vector.broadcast %12 : vector<8x1x32xf32> to vector<8x32x32xf32>
    %15 = arith.addf %13, %14 : vector<8x32x32xf32>
    %cst_11 = arith.constant 0.000000e+00 : f32
    %16 = vector.broadcast %cst_11 : f32 to vector<8x32x32xf32>
    %17 = arith.cmpf ogt, %15, %16 : vector<8x32x32xf32>
    %cst_12 = arith.constant 2.000000e-01 : f32
    %18 = vector.broadcast %cst_12 : f32 to vector<8x32x32xf32>
    %19 = arith.mulf %18, %15 : vector<8x32x32xf32>
    %20 = arith.select %17, %15, %19 : vector<8x32x32xi1>, vector<8x32x32xf32>
    %cst_13 = arith.constant dense<0xFF800000> : vector<8x32xf32>
    %21 = vector.multi_reduction <maximumf>, %20, %cst_13 [2] : vector<8x32x32xf32> to vector<8x32xf32>
    %22 = vector.shape_cast %21 : vector<8x32xf32> to vector<8x32x1xf32>
    %23 = vector.broadcast %22 : vector<8x32x1xf32> to vector<8x32x32xf32>
    %24 = arith.subf %20, %23 : vector<8x32x32xf32>
    %25 = math.exp %24 : vector<8x32x32xf32>
    %26 = vector.shape_cast %0 : vector<32x32xbf16> to vector<1x32x32xbf16>
    %27 = arith.extf %26 : vector<1x32x32xbf16> to vector<1x32x32xf32>
    %28 = vector.broadcast %27 : vector<1x32x32xf32> to vector<8x32x32xf32>
    %29 = arith.mulf %25, %28 : vector<8x32x32xf32>
    %cst_14 = arith.constant dense<0.000000e+00> : vector<8x32xf32>
    %30 = vector.multi_reduction <add>, %29, %cst_14 [2] : vector<8x32x32xf32> to vector<8x32xf32>
    %31 = vector.shape_cast %30 : vector<8x32xf32> to vector<8x32x1xf32>
    %32 = tpu.reciprocal %31 {approx = true} : vector<8x32x1xf32> -> vector<8x32x1xf32>
    %c0_15 = arith.constant 0 : index
    %c0_16 = arith.constant 0 : index
    %33 = vector.load %arg5[%c0_15, %c0_16] : memref<1x64xf32, #tpu.memory_space<vmem>>, vector<1x64xf32>
    %34 = vector.extract_strided_slice %29 {offsets = [0, 0, 0], sizes = [1, 32, 32], strides = [1, 1, 1]} : vector<8x32x32xf32> to vector<1x32x32xf32>
    %35 = vector.shape_cast %34 : vector<1x32x32xf32> to vector<32x32xf32>
    %36 = vector.extract_strided_slice %32 {offsets = [0, 0, 0], sizes = [1, 32, 1], strides = [1, 1, 1]} : vector<8x32x1xf32> to vector<1x32x1xf32>
    %37 = vector.shape_cast %36 : vector<1x32x1xf32> to vector<32x1xf32>
    %38 = vector.extract_strided_slice %4 {offsets = [0, 0], sizes = [32, 8], strides = [1, 1]} : vector<32x64xf32> to vector<32x8xf32>
    %39 = arith.truncf %35 : vector<32x32xf32> to vector<32x32xbf16>
    %40 = arith.truncf %38 : vector<32x8xf32> to vector<32x8xbf16>
    %cst_17 = arith.constant dense<0.000000e+00> : vector<32x8xf32>
    %41 = tpu.matmul %39, %40, %cst_17 {dimension_numbers = #tpu.dot_dimension_numbers<[1], [0], [0], [1], [0, 0, 1, 1], [], []>} : vector<32x32xbf16>, vector<32x8xbf16>, vector<32x8xf32> -> vector<32x8xf32>
    %42 = vector.broadcast %37 : vector<32x1xf32> to vector<32x8xf32>
    %43 = arith.mulf %41, %42 : vector<32x8xf32>
    %44 = vector.extract_strided_slice %33 {offsets = [0, 0], sizes = [1, 8], strides = [1, 1]} : vector<1x64xf32> to vector<1x8xf32>
    %45 = vector.broadcast %44 : vector<1x8xf32> to vector<32x8xf32>
    %46 = arith.addf %43, %45 : vector<32x8xf32>
    %cst_18 = arith.constant 0.000000e+00 : f32
    %47 = vector.broadcast %cst_18 : f32 to vector<32x8xf32>
    %48 = arith.cmpf ogt, %46, %47 : vector<32x8xf32>
    %cst_19 = arith.constant 0.000000e+00 : f32
    %49 = vector.broadcast %cst_19 : f32 to vector<32x8xf32>
    %50 = arith.minimumf %46, %49 : vector<32x8xf32>
    %51 = math.exp %50 : vector<32x8xf32>
    %cst_20 = arith.constant 1.000000e+00 : f32
    %52 = vector.broadcast %cst_20 : f32 to vector<32x8xf32>
    %53 = arith.subf %51, %52 : vector<32x8xf32>
    %54 = arith.select %48, %46, %53 : vector<32x8xi1>, vector<32x8xf32>
    %c0_21 = arith.constant 0 : index
    %c0_22 = arith.constant 0 : index
    %55 = vector.load %arg11[%c0_21, %c0_22] : memref<32x64xf32, #tpu.memory_space<vmem>>, vector<32x8xf32>
    tpu.vector_store %arg11[%c0_21, %c0_22], %54 {strides = array<i32>} : memref<32x64xf32, #tpu.memory_space<vmem>>, vector<32x8xf32>,
    %56 = vector.extract_strided_slice %29 {offsets = [1, 0, 0], sizes = [1, 32, 32], strides = [1, 1, 1]} : vector<8x32x32xf32> to vector<1x32x32xf32>
    %57 = vector.shape_cast %56 : vector<1x32x32xf32> to vector<32x32xf32>
    %58 = vector.extract_strided_slice %32 {offsets = [1, 0, 0], sizes = [1, 32, 1], strides = [1, 1, 1]} : vector<8x32x1xf32> to vector<1x32x1xf32>
    %59 = vector.shape_cast %58 : vector<1x32x1xf32> to vector<32x1xf32>
    %60 = vector.extract_strided_slice %4 {offsets = [0, 8], sizes = [32, 8], strides = [1, 1]} : vector<32x64xf32> to vector<32x8xf32>
    %61 = arith.truncf %57 : vector<32x32xf32> to vector<32x32xbf16>
    %62 = arith.truncf %60 : vector<32x8xf32> to vector<32x8xbf16>
    %cst_23 = arith.constant dense<0.000000e+00> : vector<32x8xf32>
    %63 = tpu.matmul %61, %62, %cst_23 {dimension_numbers = #tpu.dot_dimension_numbers<[1], [0], [0], [1], [0, 0, 1, 1], [], []>} : vector<32x32xbf16>, vector<32x8xbf16>, vector<32x8xf32> -> vector<32x8xf32>
    %64 = vector.broadcast %59 : vector<32x1xf32> to vector<32x8xf32>
    %65 = arith.mulf %63, %64 : vector<32x8xf32>
    %66 = vector.extract_strided_slice %33 {offsets = [0, 8], sizes = [1, 8], strides = [1, 1]} : vector<1x64xf32> to vector<1x8xf32>
    %67 = vector.broadcast %66 : vector<1x8xf32> to vector<32x8xf32>
    %68 = arith.addf %65, %67 : vector<32x8xf32>
    %cst_24 = arith.constant 0.000000e+00 : f32
    %69 = vector.broadcast %cst_24 : f32 to vector<32x8xf32>
    %70 = arith.cmpf ogt, %68, %69 : vector<32x8xf32>
    %cst_25 = arith.constant 0.000000e+00 : f32
    %71 = vector.broadcast %cst_25 : f32 to vector<32x8xf32>
    %72 = arith.minimumf %68, %71 : vector<32x8xf32>
    %73 = math.exp %72 : vector<32x8xf32>
    %cst_26 = arith.constant 1.000000e+00 : f32
    %74 = vector.broadcast %cst_26 : f32 to vector<32x8xf32>
    %75 = arith.subf %73, %74 : vector<32x8xf32>
    %76 = arith.select %70, %68, %75 : vector<32x8xi1>, vector<32x8xf32>
    %c0_27 = arith.constant 0 : index
    %c8 = arith.constant 8 : index
    %77 = vector.load %arg11[%c0_27, %c8] : memref<32x64xf32, #tpu.memory_space<vmem>>, vector<32x8xf32>
    tpu.vector_store %arg11[%c0_27, %c8], %76 {strides = array<i32>} : memref<32x64xf32, #tpu.memory_space<vmem>>, vector<32x8xf32>,
    %78 = vector.extract_strided_slice %29 {offsets = [2, 0, 0], sizes = [1, 32, 32], strides = [1, 1, 1]} : vector<8x32x32xf32> to vector<1x32x32xf32>
    %79 = vector.shape_cast %78 : vector<1x32x32xf32> to vector<32x32xf32>
    %80 = vector.extract_strided_slice %32 {offsets = [2, 0, 0], sizes = [1, 32, 1], strides = [1, 1, 1]} : vector<8x32x1xf32> to vector<1x32x1xf32>
    %81 = vector.shape_cast %80 : vector<1x32x1xf32> to vector<32x1xf32>
    %82 = vector.extract_strided_slice %4 {offsets = [0, 16], sizes = [32, 8], strides = [1, 1]} : vector<32x64xf32> to vector<32x8xf32>
    %83 = arith.truncf %79 : vector<32x32xf32> to vector<32x32xbf16>
    %84 = arith.truncf %82 : vector<32x8xf32> to vector<32x8xbf16>
    %cst_28 = arith.constant dense<0.000000e+00> : vector<32x8xf32>
    %85 = tpu.matmul %83, %84, %cst_28 {dimension_numbers = #tpu.dot_dimension_numbers<[1], [0], [0], [1], [0, 0, 1, 1], [], []>} : vector<32x32xbf16>, vector<32x8xbf16>, vector<32x8xf32> -> vector<32x8xf32>
    %86 = vector.broadcast %81 : vector<32x1xf32> to vector<32x8xf32>
    %87 = arith.mulf %85, %86 : vector<32x8xf32>
    %88 = vector.extract_strided_slice %33 {offsets = [0, 16], sizes = [1, 8], strides = [1, 1]} : vector<1x64xf32> to vector<1x8xf32>
    %89 = vector.broadcast %88 : vector<1x8xf32> to vector<32x8xf32>
    %90 = arith.addf %87, %89 : vector<32x8xf32>
    %cst_29 = arith.constant 0.000000e+00 : f32
    %91 = vector.broadcast %cst_29 : f32 to vector<32x8xf32>
    %92 = arith.cmpf ogt, %90, %91 : vector<32x8xf32>
    %cst_30 = arith.constant 0.000000e+00 : f32
    %93 = vector.broadcast %cst_30 : f32 to vector<32x8xf32>
    %94 = arith.minimumf %90, %93 : vector<32x8xf32>
    %95 = math.exp %94 : vector<32x8xf32>
    %cst_31 = arith.constant 1.000000e+00 : f32
    %96 = vector.broadcast %cst_31 : f32 to vector<32x8xf32>
    %97 = arith.subf %95, %96 : vector<32x8xf32>
    %98 = arith.select %92, %90, %97 : vector<32x8xi1>, vector<32x8xf32>
    %c0_32 = arith.constant 0 : index
    %c16 = arith.constant 16 : index
    %99 = vector.load %arg11[%c0_32, %c16] : memref<32x64xf32, #tpu.memory_space<vmem>>, vector<32x8xf32>
    tpu.vector_store %arg11[%c0_32, %c16], %98 {strides = array<i32>} : memref<32x64xf32, #tpu.memory_space<vmem>>, vector<32x8xf32>,
    %100 = vector.extract_strided_slice %29 {offsets = [3, 0, 0], sizes = [1, 32, 32], strides = [1, 1, 1]} : vector<8x32x32xf32> to vector<1x32x32xf32>
    %101 = vector.shape_cast %100 : vector<1x32x32xf32> to vector<32x32xf32>
    %102 = vector.extract_strided_slice %32 {offsets = [3, 0, 0], sizes = [1, 32, 1], strides = [1, 1, 1]} : vector<8x32x1xf32> to vector<1x32x1xf32>
    %103 = vector.shape_cast %102 : vector<1x32x1xf32> to vector<32x1xf32>
    %104 = vector.extract_strided_slice %4 {offsets = [0, 24], sizes = [32, 8], strides = [1, 1]} : vector<32x64xf32> to vector<32x8xf32>
    %105 = arith.truncf %101 : vector<32x32xf32> to vector<32x32xbf16>
    %106 = arith.truncf %104 : vector<32x8xf32> to vector<32x8xbf16>
    %cst_33 = arith.constant dense<0.000000e+00> : vector<32x8xf32>
    %107 = tpu.matmul %105, %106, %cst_33 {dimension_numbers = #tpu.dot_dimension_numbers<[1], [0], [0], [1], [0, 0, 1, 1], [], []>} : vector<32x32xbf16>, vector<32x8xbf16>, vector<32x8xf32> -> vector<32x8xf32>
    %108 = vector.broadcast %103 : vector<32x1xf32> to vector<32x8xf32>
    %109 = arith.mulf %107, %108 : vector<32x8xf32>
    %110 = vector.extract_strided_slice %33 {offsets = [0, 24], sizes = [1, 8], strides = [1, 1]} : vector<1x64xf32> to vector<1x8xf32>
    %111 = vector.broadcast %110 : vector<1x8xf32> to vector<32x8xf32>
    %112 = arith.addf %109, %111 : vector<32x8xf32>
    %cst_34 = arith.constant 0.000000e+00 : f32
    %113 = vector.broadcast %cst_34 : f32 to vector<32x8xf32>
    %114 = arith.cmpf ogt, %112, %113 : vector<32x8xf32>
    %cst_35 = arith.constant 0.000000e+00 : f32
    %115 = vector.broadcast %cst_35 : f32 to vector<32x8xf32>
    %116 = arith.minimumf %112, %115 : vector<32x8xf32>
    %117 = math.exp %116 : vector<32x8xf32>
    %cst_36 = arith.constant 1.000000e+00 : f32
    %118 = vector.broadcast %cst_36 : f32 to vector<32x8xf32>
    %119 = arith.subf %117, %118 : vector<32x8xf32>
    %120 = arith.select %114, %112, %119 : vector<32x8xi1>, vector<32x8xf32>
    %c0_37 = arith.constant 0 : index
    %c24 = arith.constant 24 : index
    %121 = vector.load %arg11[%c0_37, %c24] : memref<32x64xf32, #tpu.memory_space<vmem>>, vector<32x8xf32>
    tpu.vector_store %arg11[%c0_37, %c24], %120 {strides = array<i32>} : memref<32x64xf32, #tpu.memory_space<vmem>>, vector<32x8xf32>,
    %122 = vector.extract_strided_slice %29 {offsets = [4, 0, 0], sizes = [1, 32, 32], strides = [1, 1, 1]} : vector<8x32x32xf32> to vector<1x32x32xf32>
    %123 = vector.shape_cast %122 : vector<1x32x32xf32> to vector<32x32xf32>
    %124 = vector.extract_strided_slice %32 {offsets = [4, 0, 0], sizes = [1, 32, 1], strides = [1, 1, 1]} : vector<8x32x1xf32> to vector<1x32x1xf32>
    %125 = vector.shape_cast %124 : vector<1x32x1xf32> to vector<32x1xf32>
    %126 = vector.extract_strided_slice %4 {offsets = [0, 32], sizes = [32, 8], strides = [1, 1]} : vector<32x64xf32> to vector<32x8xf32>
    %127 = arith.truncf %123 : vector<32x32xf32> to vector<32x32xbf16>
    %128 = arith.truncf %126 : vector<32x8xf32> to vector<32x8xbf16>
    %cst_38 = arith.constant dense<0.000000e+00> : vector<32x8xf32>
    %129 = tpu.matmul %127, %128, %cst_38 {dimension_numbers = #tpu.dot_dimension_numbers<[1], [0], [0], [1], [0, 0, 1, 1], [], []>} : vector<32x32xbf16>, vector<32x8xbf16>, vector<32x8xf32> -> vector<32x8xf32>
    %130 = vector.broadcast %125 : vector<32x1xf32> to vector<32x8xf32>
    %131 = arith.mulf %129, %130 : vector<32x8xf32>
    %132 = vector.extract_strided_slice %33 {offsets = [0, 32], sizes = [1, 8], strides = [1, 1]} : vector<1x64xf32> to vector<1x8xf32>
    %133 = vector.broadcast %132 : vector<1x8xf32> to vector<32x8xf32>
    %134 = arith.addf %131, %133 : vector<32x8xf32>
    %cst_39 = arith.constant 0.000000e+00 : f32
    %135 = vector.broadcast %cst_39 : f32 to vector<32x8xf32>
    %136 = arith.cmpf ogt, %134, %135 : vector<32x8xf32>
    %cst_40 = arith.constant 0.000000e+00 : f32
    %137 = vector.broadcast %cst_40 : f32 to vector<32x8xf32>
    %138 = arith.minimumf %134, %137 : vector<32x8xf32>
    %139 = math.exp %138 : vector<32x8xf32>
    %cst_41 = arith.constant 1.000000e+00 : f32
    %140 = vector.broadcast %cst_41 : f32 to vector<32x8xf32>
    %141 = arith.subf %139, %140 : vector<32x8xf32>
    %142 = arith.select %136, %134, %141 : vector<32x8xi1>, vector<32x8xf32>
    %c0_42 = arith.constant 0 : index
    %c32 = arith.constant 32 : index
    %143 = vector.load %arg11[%c0_42, %c32] : memref<32x64xf32, #tpu.memory_space<vmem>>, vector<32x8xf32>
    tpu.vector_store %arg11[%c0_42, %c32], %142 {strides = array<i32>} : memref<32x64xf32, #tpu.memory_space<vmem>>, vector<32x8xf32>,
    %144 = vector.extract_strided_slice %29 {offsets = [5, 0, 0], sizes = [1, 32, 32], strides = [1, 1, 1]} : vector<8x32x32xf32> to vector<1x32x32xf32>
    %145 = vector.shape_cast %144 : vector<1x32x32xf32> to vector<32x32xf32>
    %146 = vector.extract_strided_slice %32 {offsets = [5, 0, 0], sizes = [1, 32, 1], strides = [1, 1, 1]} : vector<8x32x1xf32> to vector<1x32x1xf32>
    %147 = vector.shape_cast %146 : vector<1x32x1xf32> to vector<32x1xf32>
    %148 = vector.extract_strided_slice %4 {offsets = [0, 40], sizes = [32, 8], strides = [1, 1]} : vector<32x64xf32> to vector<32x8xf32>
    %149 = arith.truncf %145 : vector<32x32xf32> to vector<32x32xbf16>
    %150 = arith.truncf %148 : vector<32x8xf32> to vector<32x8xbf16>
    %cst_43 = arith.constant dense<0.000000e+00> : vector<32x8xf32>
    %151 = tpu.matmul %149, %150, %cst_43 {dimension_numbers = #tpu.dot_dimension_numbers<[1], [0], [0], [1], [0, 0, 1, 1], [], []>} : vector<32x32xbf16>, vector<32x8xbf16>, vector<32x8xf32> -> vector<32x8xf32>
    %152 = vector.broadcast %147 : vector<32x1xf32> to vector<32x8xf32>
    %153 = arith.mulf %151, %152 : vector<32x8xf32>
    %154 = vector.extract_strided_slice %33 {offsets = [0, 40], sizes = [1, 8], strides = [1, 1]} : vector<1x64xf32> to vector<1x8xf32>
    %155 = vector.broadcast %154 : vector<1x8xf32> to vector<32x8xf32>
    %156 = arith.addf %153, %155 : vector<32x8xf32>
    %cst_44 = arith.constant 0.000000e+00 : f32
    %157 = vector.broadcast %cst_44 : f32 to vector<32x8xf32>
    %158 = arith.cmpf ogt, %156, %157 : vector<32x8xf32>
    %cst_45 = arith.constant 0.000000e+00 : f32
    %159 = vector.broadcast %cst_45 : f32 to vector<32x8xf32>
    %160 = arith.minimumf %156, %159 : vector<32x8xf32>
    %161 = math.exp %160 : vector<32x8xf32>
    %cst_46 = arith.constant 1.000000e+00 : f32
    %162 = vector.broadcast %cst_46 : f32 to vector<32x8xf32>
    %163 = arith.subf %161, %162 : vector<32x8xf32>
    %164 = arith.select %158, %156, %163 : vector<32x8xi1>, vector<32x8xf32>
    %c0_47 = arith.constant 0 : index
    %c40 = arith.constant 40 : index
    %165 = vector.load %arg11[%c0_47, %c40] : memref<32x64xf32, #tpu.memory_space<vmem>>, vector<32x8xf32>
    tpu.vector_store %arg11[%c0_47, %c40], %164 {strides = array<i32>} : memref<32x64xf32, #tpu.memory_space<vmem>>, vector<32x8xf32>,
    %166 = vector.extract_strided_slice %29 {offsets = [6, 0, 0], sizes = [1, 32, 32], strides = [1, 1, 1]} : vector<8x32x32xf32> to vector<1x32x32xf32>
    %167 = vector.shape_cast %166 : vector<1x32x32xf32> to vector<32x32xf32>
    %168 = vector.extract_strided_slice %32 {offsets = [6, 0, 0], sizes = [1, 32, 1], strides = [1, 1, 1]} : vector<8x32x1xf32> to vector<1x32x1xf32>
    %169 = vector.shape_cast %168 : vector<1x32x1xf32> to vector<32x1xf32>
    %170 = vector.extract_strided_slice %4 {offsets = [0, 48], sizes = [32, 8], strides = [1, 1]} : vector<32x64xf32> to vector<32x8xf32>
    %171 = arith.truncf %167 : vector<32x32xf32> to vector<32x32xbf16>
    %172 = arith.truncf %170 : vector<32x8xf32> to vector<32x8xbf16>
    %cst_48 = arith.constant dense<0.000000e+00> : vector<32x8xf32>
    %173 = tpu.matmul %171, %172, %cst_48 {dimension_numbers = #tpu.dot_dimension_numbers<[1], [0], [0], [1], [0, 0, 1, 1], [], []>} : vector<32x32xbf16>, vector<32x8xbf16>, vector<32x8xf32> -> vector<32x8xf32>
    %174 = vector.broadcast %169 : vector<32x1xf32> to vector<32x8xf32>
    %175 = arith.mulf %173, %174 : vector<32x8xf32>
    %176 = vector.extract_strided_slice %33 {offsets = [0, 48], sizes = [1, 8], strides = [1, 1]} : vector<1x64xf32> to vector<1x8xf32>
    %177 = vector.broadcast %176 : vector<1x8xf32> to vector<32x8xf32>
    %178 = arith.addf %175, %177 : vector<32x8xf32>
    %cst_49 = arith.constant 0.000000e+00 : f32
    %179 = vector.broadcast %cst_49 : f32 to vector<32x8xf32>
    %180 = arith.cmpf ogt, %178, %179 : vector<32x8xf32>
    %cst_50 = arith.constant 0.000000e+00 : f32
    %181 = vector.broadcast %cst_50 : f32 to vector<32x8xf32>
    %182 = arith.minimumf %178, %181 : vector<32x8xf32>
    %183 = math.exp %182 : vector<32x8xf32>
    %cst_51 = arith.constant 1.000000e+00 : f32
    %184 = vector.broadcast %cst_51 : f32 to vector<32x8xf32>
    %185 = arith.subf %183, %184 : vector<32x8xf32>
    %186 = arith.select %180, %178, %185 : vector<32x8xi1>, vector<32x8xf32>
    %c0_52 = arith.constant 0 : index
    %c48 = arith.constant 48 : index
    %187 = vector.load %arg11[%c0_52, %c48] : memref<32x64xf32, #tpu.memory_space<vmem>>, vector<32x8xf32>
    tpu.vector_store %arg11[%c0_52, %c48], %186 {strides = array<i32>} : memref<32x64xf32, #tpu.memory_space<vmem>>, vector<32x8xf32>,
    %188 = vector.extract_strided_slice %29 {offsets = [7, 0, 0], sizes = [1, 32, 32], strides = [1, 1, 1]} : vector<8x32x32xf32> to vector<1x32x32xf32>
    %189 = vector.shape_cast %188 : vector<1x32x32xf32> to vector<32x32xf32>
    %190 = vector.extract_strided_slice %32 {offsets = [7, 0, 0], sizes = [1, 32, 1], strides = [1, 1, 1]} : vector<8x32x1xf32> to vector<1x32x1xf32>
    %191 = vector.shape_cast %190 : vector<1x32x1xf32> to vector<32x1xf32>
    %192 = vector.extract_strided_slice %4 {offsets = [0, 56], sizes = [32, 8], strides = [1, 1]} : vector<32x64xf32> to vector<32x8xf32>
    %193 = arith.truncf %189 : vector<32x32xf32> to vector<32x32xbf16>
    %194 = arith.truncf %192 : vector<32x8xf32> to vector<32x8xbf16>
    %cst_53 = arith.constant dense<0.000000e+00> : vector<32x8xf32>
    %195 = tpu.matmul %193, %194, %cst_53 {dimension_numbers = #tpu.dot_dimension_numbers<[1], [0], [0], [1], [0, 0, 1, 1], [], []>} : vector<32x32xbf16>, vector<32x8xbf16>, vector<32x8xf32> -> vector<32x8xf32>
    %196 = vector.broadcast %191 : vector<32x1xf32> to vector<32x8xf32>
    %197 = arith.mulf %195, %196 : vector<32x8xf32>
    %198 = vector.extract_strided_slice %33 {offsets = [0, 56], sizes = [1, 8], strides = [1, 1]} : vector<1x64xf32> to vector<1x8xf32>
    %199 = vector.broadcast %198 : vector<1x8xf32> to vector<32x8xf32>
    %200 = arith.addf %197, %199 : vector<32x8xf32>
    %cst_54 = arith.constant 0.000000e+00 : f32
    %201 = vector.broadcast %cst_54 : f32 to vector<32x8xf32>
    %202 = arith.cmpf ogt, %200, %201 : vector<32x8xf32>
    %cst_55 = arith.constant 0.000000e+00 : f32
    %203 = vector.broadcast %cst_55 : f32 to vector<32x8xf32>
    %204 = arith.minimumf %200, %203 : vector<32x8xf32>
    %205 = math.exp %204 : vector<32x8xf32>
    %cst_56 = arith.constant 1.000000e+00 : f32
    %206 = vector.broadcast %cst_56 : f32 to vector<32x8xf32>
    %207 = arith.subf %205, %206 : vector<32x8xf32>
    %208 = arith.select %202, %200, %207 : vector<32x8xi1>, vector<32x8xf32>
    %c0_57 = arith.constant 0 : index
    %c56 = arith.constant 56 : index
    %209 = vector.load %arg11[%c0_57, %c56] : memref<32x64xf32, #tpu.memory_space<vmem>>, vector<32x8xf32>
    tpu.vector_store %arg11[%c0_57, %c56], %208 {strides = array<i32>} : memref<32x64xf32, #tpu.memory_space<vmem>>, vector<32x8xf32>,
    %c0_58 = arith.constant 0 : index
    %c0_59 = arith.constant 0 : index
    %210 = vector.load %arg11[%c0_58, %c0_59] : memref<32x64xf32, #tpu.memory_space<vmem>>, vector<32x64xf32>
    %211 = arith.truncf %210 : vector<32x64xf32> to vector<32x64xbf16>
    %c0_60 = arith.constant 0 : index
    %c0_61 = arith.constant 0 : index
    %212 = vector.load %arg6[%c0_60, %c0_61] : memref<64x4xbf16, #tpu.memory_space<vmem>>, vector<64x4xbf16>
    %cst_62 = arith.constant dense<0.000000e+00> : vector<32x4xf32>
    %213 = tpu.matmul %211, %212, %cst_62 {dimension_numbers = #tpu.dot_dimension_numbers<[1], [0], [0], [1], [0, 0, 1, 1], [], []>} : vector<32x64xbf16>, vector<64x4xbf16>, vector<32x4xf32> -> vector<32x4xf32>
    %c0_63 = arith.constant 0 : index
    %c0_64 = arith.constant 0 : index
    %214 = vector.load %arg8[%c0_63, %c0_64] : memref<4x1xf32, #tpu.memory_space<vmem>>, vector<4x1xf32>
    %cst_65 = arith.constant dense<0.000000e+00> : vector<32x1xf32>
    %215 = tpu.matmul %213, %214, %cst_65 {dimension_numbers = #tpu.dot_dimension_numbers<[1], [0], [0], [1], [0, 0, 1, 1], [], []>} : vector<32x4xf32>, vector<4x1xf32>, vector<32x1xf32> -> vector<32x1xf32>
    %c0_66 = arith.constant 0 : index
    %c0_67 = arith.constant 0 : index
    %216 = vector.load %arg7[%c0_66, %c0_67] : memref<4x1xf32, #tpu.memory_space<vmem>>, vector<4x1xf32>
    %cst_68 = arith.constant dense<0.000000e+00> : vector<32x1xf32>
    %217 = tpu.matmul %213, %216, %cst_68 {dimension_numbers = #tpu.dot_dimension_numbers<[1], [0], [0], [1], [0, 0, 1, 1], [], []>} : vector<32x4xf32>, vector<4x1xf32>, vector<32x1xf32> -> vector<32x1xf32>
    %218 = tpu.transpose %215, [1, 0] : vector<32x1xf32> -> vector<1x32xf32>
    %219 = vector.shape_cast %218 : vector<1x32xf32> to vector<1x32x1xf32>
    %220 = tpu.transpose %217, [1, 0] : vector<32x1xf32> -> vector<1x32xf32>
    %221 = vector.shape_cast %220 : vector<1x32xf32> to vector<1x1x32xf32>
    %222 = vector.broadcast %219 : vector<1x32x1xf32> to vector<1x32x32xf32>
    %223 = vector.broadcast %221 : vector<1x1x32xf32> to vector<1x32x32xf32>
    %224 = arith.addf %222, %223 : vector<1x32x32xf32>
    %cst_69 = arith.constant 0.000000e+00 : f32
    %225 = vector.broadcast %cst_69 : f32 to vector<1x32x32xf32>
    %226 = arith.cmpf ogt, %224, %225 : vector<1x32x32xf32>
    %cst_70 = arith.constant 2.000000e-01 : f32
    %227 = vector.broadcast %cst_70 : f32 to vector<1x32x32xf32>
    %228 = arith.mulf %227, %224 : vector<1x32x32xf32>
    %229 = arith.select %226, %224, %228 : vector<1x32x32xi1>, vector<1x32x32xf32>
    %cst_71 = arith.constant dense<0xFF800000> : vector<1x32xf32>
    %230 = vector.multi_reduction <maximumf>, %229, %cst_71 [2] : vector<1x32x32xf32> to vector<1x32xf32>
    %231 = vector.shape_cast %230 : vector<1x32xf32> to vector<1x32x1xf32>
    %232 = vector.broadcast %231 : vector<1x32x1xf32> to vector<1x32x32xf32>
    %233 = arith.subf %229, %232 : vector<1x32x32xf32>
    %234 = math.exp %233 : vector<1x32x32xf32>
    %235 = vector.shape_cast %0 : vector<32x32xbf16> to vector<1x32x32xbf16>
    %236 = arith.extf %235 : vector<1x32x32xbf16> to vector<1x32x32xf32>
    %237 = arith.mulf %234, %236 : vector<1x32x32xf32>
    %cst_72 = arith.constant dense<0.000000e+00> : vector<1x32xf32>
    %238 = vector.multi_reduction <add>, %237, %cst_72 [2] : vector<1x32x32xf32> to vector<1x32xf32>
    %239 = vector.shape_cast %238 : vector<1x32xf32> to vector<1x32x1xf32>
    %240 = tpu.reciprocal %239 {approx = true} : vector<1x32x1xf32> -> vector<1x32x1xf32>
    %241 = vector.shape_cast %237 : vector<1x32x32xf32> to vector<32x32xf32>
    %242 = vector.shape_cast %240 : vector<1x32x1xf32> to vector<32x1xf32>
    %243 = arith.truncf %241 : vector<32x32xf32> to vector<32x32xbf16>
    %244 = arith.truncf %213 : vector<32x4xf32> to vector<32x4xbf16>
    %cst_73 = arith.constant dense<0.000000e+00> : vector<32x4xf32>
    %245 = tpu.matmul %243, %244, %cst_73 {dimension_numbers = #tpu.dot_dimension_numbers<[1], [0], [0], [1], [0, 0, 1, 1], [], []>} : vector<32x32xbf16>, vector<32x4xbf16>, vector<32x4xf32> -> vector<32x4xf32>
    %246 = vector.broadcast %242 : vector<32x1xf32> to vector<32x4xf32>
    %247 = arith.mulf %245, %246 : vector<32x4xf32>
    %c0_74 = arith.constant 0 : index
    %c0_75 = arith.constant 0 : index
    %248 = vector.load %arg9[%c0_74, %c0_75] : memref<1x4xf32, #tpu.memory_space<vmem>>, vector<1x4xf32>
    %249 = vector.broadcast %248 : vector<1x4xf32> to vector<32x4xf32>
    %250 = arith.addf %247, %249 : vector<32x4xf32>
    %cst_76 = arith.constant dense<0xFF800000> : vector<32xf32>
    %251 = vector.multi_reduction <maximumf>, %250, %cst_76 [1] : vector<32x4xf32> to vector<32xf32>
    %252 = vector.shape_cast %251 : vector<32xf32> to vector<32x1xf32>
    %253 = vector.broadcast %252 : vector<32x1xf32> to vector<32x4xf32>
    %254 = arith.subf %250, %253 : vector<32x4xf32>
    %255 = math.exp %254 : vector<32x4xf32>
    %cst_77 = arith.constant dense<0.000000e+00> : vector<32xf32>
    %256 = vector.multi_reduction <add>, %255, %cst_77 [1] : vector<32x4xf32> to vector<32xf32>
    %257 = vector.shape_cast %256 : vector<32xf32> to vector<32x1xf32>
    %258 = math.log %257 : vector<32x1xf32>
    %259 = vector.broadcast %258 : vector<32x1xf32> to vector<32x4xf32>
    %260 = arith.subf %254, %259 : vector<32x4xf32>
    %c0_78 = arith.constant 0 : index
    %c0_79 = arith.constant 0 : index
    %261 = vector.load %arg10[%c0_78, %c0_79] : memref<32x4xf32, #tpu.memory_space<vmem>>, vector<32x4xf32>
    tpu.vector_store %arg10[%c0_78, %c0_79], %260 {strides = array<i32>} : memref<32x4xf32, #tpu.memory_space<vmem>>, vector<32x4xf32>,
    return
  }
}

</mosaic_0001>

<bundles_post_ra>
// kernel: tpu_custom_call.1
= control target key start
LH: loop header
LB: loop body
LE: loop exit
PB: predicated region body
PF: predicated region fallthrough
CT: control target
= control target key end

     0   :  { %vm54_vm0 = vcmask 130048   ;;  %vm118_vm1 = vcmask 523264   ;;  %s3165_s11 = smov 104   ;;  %s3166_s12 = smov 96   ;;  %v341_v45 = vlaneseq  ;;  %vm743_vm3 = vcmask 261120   ;;  %s4010_s2 = inlined_call_operand.vmem [shape: bf16[16,64], index: 2, kind: input, shape index: {}]   ;;  %s4011_s0 = inlined_call_operand.vmem [shape: f32[32,16], index: 0, kind: input, shape index: {}]   ;;  %s4012_s4 = inlined_call_operand.vmem [shape: f32[64,8], index: 4, kind: input, shape index: {}]   ;;  %s4013_s3 = inlined_call_operand.vmem [shape: f32[64,8], index: 3, kind: input, shape index: {}]   ;;  %s4014_s5 = inlined_call_operand.vmem [shape: f32[1,64], index: 5, kind: input, shape index: {}]   ;;  %s4015_s1 = inlined_call_operand.vmem [shape: bf16[32,32], index: 1, kind: input, shape index: {}]   ;;  %s4016_s6 = inlined_call_operand.vmem [shape: bf16[64,4], index: 6, kind: input, shape index: {}]   ;;  %s4017_s8 = inlined_call_operand.vmem [shape: f32[4,1], index: 8, kind: input, shape index: {}]   ;;  %s4018_s7 = inlined_call_operand.vmem [shape: f32[4,1], index: 7, kind: input, shape index: {}]   ;;  %s4019_s9 = inlined_call_operand.vmem [shape: f32[1,4], index: 9, kind: input, shape index: {}]   ;;  %s4020_s10 = inlined_call_operand.vmem [shape: f32[32,4], index: 10, kind: output, shape index: {}]  }
   0x1   :  { %v2933_v0 = vld [vmem:[%s4010_s2] sm:$0xff]   ;;  %v41_v2 = vld [vmem:[%s4011_s0 + $0x8] sm:$0xff]  ;;  %v42_v3 = vld [vmem:[%s4011_s0 + $0x10] sm:$0xff]  ;;  %s3167_s13 = smov 88   ;;  %s3168_s14 = smov 80  }
   0x2   :  { %v40_v1 = vld [vmem:[%s4011_s0] sm:$0xff]  ;;  %2767 = vmatprep.subr.bf16.mxu0 %v2933_v0  ;;  %v43_v5 = vld [vmem:[%s4011_s0 + $0x18] sm:$0xff]  ;;  %v116_v9 = vld [vmem:[%s4012_s4 + $0x30] sm:$0xff]  ;;  %s3169_s15 = smov 72   ;;  %v342_v47 = vshrl.u32 %v341_v45, 7  ;;  %s3172_s22 = smov 16  }
   0x3   :  { %v44_v4 = vpack.c.bf16 %v41_v2, %v40_v1  ;;  %v117_v6 = vld [vmem:[%s4012_s4 + $0x38] sm:$0xff]  ;;  %2768 = vmatpush3.bf16.msra.mxu0 %v2933_v0  ;;  %v45_v8 = vpack.c.bf16 %v43_v5, %v42_v3  ;;  %v222_v10 = vld [vmem:[%s4013_s3 + $0x30] sm:$0xff]  ;;  %v115_v11 = vld [vmem:[%s4012_s4 + $0x28] sm:$0xff]  ;;  %v3170_v2 = vmov 1966171168   ;;  %s3173_s2 = smov 24  }
   0x4   :  { %v223_v7 = vld [vmem:[%s4013_s3 + $0x38] sm:$0xff]  ;;  %2773 = vmatprep.subr.mxu1 %v117_v6  ;;  %v221_v12 = vld [vmem:[%s4013_s3 + $0x28] sm:$0xff]  ;;  %v114_v13 = vld [vmem:[%s4012_s4 + $0x20] sm:$0xff]  ;;  %v362_v49 = vsub.s32 1, %v342_v47  ;;  %v3345_v50 = vsub.s32 0, %v342_v47  ;;  %v419_v54 = vsub.s32 4, %v342_v47  ;;  %v528_v3 = vunpack.c.l.s4 %v3170_v2 }
   0x5   :  { %2769 = vmatprep.mubr.msk.bf16.mxu0 %vm54_vm0, %v44_v4  ;;  %2795 = vmatprep.subr.mxu0 %v223_v7  ;;  %v220_v14 = vld [vmem:[%s4013_s3 + $0x20] sm:$0xff]  ;;  %v113_v15 = vld [vmem:[%s4012_s4 + $0x18] sm:$0xff]  ;;  %v112_v17 = vld [vmem:[%s4012_s4 + $0x10] sm:$0xff]  ;;  %v438_v56 = vsub.s32 5, %v342_v47  ;;  %v381_v58 = vsub.s32 2, %v342_v47  ;;  %v400_v60 = vsub.s32 3, %v342_v47 }
   0x6   :  { %2774 = vmatpush3.msra.mxu1 %v117_v6  ;;  %2770 = vmatmul.mubr.msk.bf16.vlgmr.msra.gmra.mxu0 %vm54_vm0, %v45_v8  ;;  %v219_v16 = vld [vmem:[%s4013_s3 + $0x18] sm:$0xff]  ;;  %v218_v18 = vld [vmem:[%s4013_s3 + $0x10] sm:$0xff]  ;;  %v111_v19 = vld [vmem:[%s4012_s4 + $0x8] sm:$0xff]  ;;  %v457_v62 = vsub.s32 6, %v342_v47  ;;  %v476_v0 = vsub.s32 7, %v342_v47  ;;  %v529_v4 = vunpack.c.0.s8 %v528_v3  ;;  %s3174_s23 = smov 32  }
   0x7   :  { %2775 = vmatprep.subr.mxu1 %v116_v9  ;;  %2796 = vmatpush3.msra.mxu0 %v223_v7  ;;  %v217_v20 = vld [vmem:[%s4013_s3 + $0x8] sm:$0xff]  ;;  %v110_v21 = vld [vmem:[%s4012_s4] sm:$0xff]  ;;  %s3163_s4 = smov 112   ;;  %s3175_s24 = smov 40  }
   0x8   :  { %2776 = vmatpush3.msra.mxu1 %v116_v9  ;;  %2797 = vmatprep.subr.mxu0 %v222_v10  ;;  %v216_v22 = vld [vmem:[%s4013_s3] sm:$0xff]  ;;  %s3164_s3 = smov 120   ;;  %v3350_v6 = vsub.s32 %v529_v4, %v342_v47  ;;  %s3176_s27 = smov 48  }
   0x9   :  { %2777 = vmatprep.subr.mxu1 %v115_v11  ;;  %2798 = vmatpush3.msra.mxu0 %v222_v10 }
   0xa   :  { %2778 = vmatpush3.msra.mxu1 %v115_v11  ;;  %2799 = vmatprep.subr.mxu0 %v221_v12 }
   0xb   :  { %2779 = vmatprep.subr.mxu1 %v114_v13  ;;  %2800 = vmatpush3.msra.mxu0 %v221_v12 }
   0xc   :  { %2780 = vmatpush3.msra.mxu1 %v114_v13  ;;  %2801 = vmatprep.subr.mxu0 %v220_v14 }
   0xd   :  { %2781 = vmatprep.subr.mxu1 %v113_v15  ;;  %2802 = vmatpush3.msra.mxu0 %v220_v14 }
   0xe   :  { %2782 = vmatpush3.msra.mxu1 %v113_v15  ;;  %2803 = vmatprep.subr.mxu0 %v219_v16 }
   0xf   :  { %2804 = vmatpush3.msra.mxu0 %v219_v16  ;;  %2783 = vmatprep.subr.mxu1 %v112_v17 }
  0x10   :  { %2805 = vmatprep.subr.mxu0 %v218_v18  ;;  %2784 = vmatpush3.msra.mxu1 %v112_v17 }
  0x11   :  { %2806 = vmatpush3.msra.mxu0 %v218_v18  ;;  %2785 = vmatprep.subr.mxu1 %v111_v19 }
  0x12   :  { %2807 = vmatprep.subr.mxu0 %v217_v20  ;;  %2786 = vmatpush3.msra.mxu1 %v111_v19 }
  0x13   :  { %2808 = vmatpush3.msra.mxu0 %v217_v20  ;;  %2787 = vmatprep.subr.mxu1 %v110_v21 }
  0x14   :  { %2809 = vmatprep.subr.mxu0 %v216_v22  ;;  %2788 = vmatpush3.msra.mxu1 %v110_v21 }
  0x15   :  { %2810 = vmatpush3.msra.mxu0 %v216_v22 }
  0xc6   :  { %v2771_v23 = vpop.f32.mrf.mxu0 }
  0xc8   :  { %v95_v24 = vpop.f32.mrf.mxu0 }
  0xc9   :  { %2789 = vmatprep.mubr.msk.f32.mxu1 %vm118_vm1, %v95_v24  ;;  %2811 = vmatprep.mubr.msk.f32.mxu0 %vm118_vm1, %v95_v24 }
  0xca   :  { %v2772_v25 = vpop.f32.mrf.mxu0 }
  0xcb   :  { %v1104_v26 = vpack.c.bf16 %v2772_v25, %v2771_v23 }
  0xcc   :  { %v98_v27 = vpop.f32.mrf.mxu0 }
  0xcd   :  { %v3300_v28 = vpack.c.bf16 %v98_v27, %v95_v24  ;;  %1328 = vrot.lane.b32.xlu1 %v1104_v26, %s3163_s4  ;;  %1209 = vrot.lane.b32.xlu0 %v1104_v26, %s3164_s3 }
  0xce   :  { %2790 = vmatmul.mubr.msk.f32.vlgmr.msra.gmra.mxu1 %vm118_vm1, %v98_v27  ;;  %2812 = vmatmul.mubr.msk.f32.vlgmr.msra.gmra.mxu0 %vm118_vm1, %v98_v27 }
  0xcf   :  { %2817 = vmatprep.subr.bf16.mxu1 %v1104_v26  ;;  %2792 = vmatprep.mubr.msk.f32.mxu1 %vm118_vm1, %v2771_v23 }
  0xd0   :  { %2814 = vmatprep.mubr.msk.f32.mxu0 %vm118_vm1, %v2771_v23  ;;  %2818 = vmatpush3.bf16.msra.mxu1 %v1104_v26 }
  0xd1   :  { %2819 = vmatprep.subr.bf16.mxu1 %v3300_v28  ;;  %1447 = vrot.lane.b32.xlu1 %v1104_v26, %s3165_s11 }
  0xd2   :  { %1566 = vrot.lane.b32.xlu0 %v1104_v26, %s3166_s12  ;;  %2793 = vmatmul.mubr.msk.f32.gmra.mxu1 %vm118_vm1, %v2772_v25 }
  0xd3   :  { %2815 = vmatmul.mubr.msk.f32.gmra.mxu0 %vm118_vm1, %v2772_v25 }
  0xd4   :  { %2820 = vmatpush3.bf16.msra.mxu1 %v3300_v28 }
  0xd5   :  { %1685 = vrot.lane.b32.xlu1 %v1104_v26, %s3167_s13 }
  0xd6   :  { %1804 = vrot.lane.b32.xlu0 %v1104_v26, %s3168_s14 }
  0xd9   :  { %1923 = vrot.lane.b32.xlu1 %v1104_v26, %s3169_s15 }
  0xda   :  { %1326 = vrot.lane.b32.xlu0 %v3300_v28, %s3163_s4 }
  0xdd   :  { %1207 = vrot.lane.b32.xlu1 %v3300_v28, %s3164_s3 }
  0xde   :  { %1564 = vrot.lane.b32.xlu0 %v3300_v28, %s3166_s12 }
  0xe1   :  { %1445 = vrot.lane.b32.xlu1 %v3300_v28, %s3165_s11 }
  0xe5   :  { %1683 = vrot.lane.b32.xlu1 %v3300_v28, %s3167_s13 }
 0x13f   :  { %v3327_v29 = vpop.permute.xlu1 %1328  ;;  %v1210_v30 = vpop.permute.xlu0 %1209 }
 0x140   :  { %2825 = vmatprep.subr.bf16.mxu0 %v1210_v30  ;;  %2833 = vmatprep.subr.bf16.mxu1 %v3327_v29 }
 0x141   :  { %2826 = vmatpush3.bf16.msra.mxu0 %v1210_v30 }
 0x143   :  { %v3330_v31 = vpop.permute.xlu1 %1447 }
 0x144   :  { %v3337_v43 = vpop.permute.xlu0 %1566 }
 0x147   :  { %v3332_v32 = vpop.permute.xlu1 %1685 }
 0x148   :  { %v3339_v44 = vpop.permute.xlu0 %1804 }
 0x14b   :  { %v3334_v33 = vpop.permute.xlu1 %1923 }
 0x14c   :  { %v3341_v46 = vpop.permute.xlu0 %1326 }
 0x14f   :  { %v1208_v34 = vpop.permute.xlu1 %1207 }
 0x150   :  { %2827 = vmatprep.subr.bf16.mxu0 %v1208_v34  ;;  %v3343_v48 = vpop.permute.xlu0 %1564 }
 0x151   :  { %2828 = vmatpush3.bf16.msra.mxu0 %v1208_v34 }
 0x152   :  { %2841 = vmatprep.subr.bf16.mxu0 %v3330_v31 }
 0x153   :  { %v3348_v5 = vpop.permute.xlu1 %1445 }
 0x157   :  { %v3354_v8 = vpop.permute.xlu1 %1683 }
 0x18e   :  { %v2791_v35 = vpop.f32.mrf.mxu1  ;;  %v2813_v39 = vpop.f32.mrf.mxu0 }
 0x190   :  { %v197_v36 = vpop.f32.mrf.mxu1  ;;  %v290_v40 = vpop.f32.mrf.mxu0 }
 0x191   :  { %309 = vxpose.xlu0.b32.start [1/4] (short) (narrow) %v197_v36, 8 }
 0x192   :  { %v2794_v37 = vpop.f32.mrf.mxu1 }
 0x193   :  { %v2816_v41 = vpop.f32.mrf.mxu0 }
 0x194   :  { %v207_v38 = vpop.f32.mrf.mxu1 }
 0x195   :  { %310 = vxpose.xlu0.b32.cont [2/4] (short) (narrow) %v2791_v35, 8  ;;  %v300_v42 = vpop.f32.mrf.mxu0 }
 0x199   :  { %311 = vxpose.xlu0.b32.cont [3/4] (short) (narrow) %v207_v38, 8 }
 0x19d   :  { %312 = vxpose.xlu0.b32.end [4/4] (short) (narrow) %v2794_v37, 8 }
 0x1a1   :  { %493 = vxpose.xlu0.b32.start [1/4] (short) (narrow) %v290_v40, 8 }
 0x1a5   :  { %494 = vxpose.xlu0.b32.cont [2/4] (short) (narrow) %v2813_v39, 8 }
 0x1a9   :  { %495 = vxpose.xlu0.b32.cont [3/4] (short) (narrow) %v300_v42, 8 }
 0x1ad   :  { %496 = vxpose.xlu0.b32.end [4/4] (short) (narrow) %v2816_v41, 8 }
 0x20d   :  { %v325_v51 = vpop.trf.xlu0 }
 0x20e   :  { %v363_v52 = vrot.slane %v325_v51, %v362_v49  ;;  %v344_v53 = vrot.slane %v325_v51, %v3345_v50  ;;  %v420_v55 = vrot.slane %v325_v51, %v419_v54  ;;  %v439_v57 = vrot.slane %v325_v51, %v438_v56 }
 0x20f   :  { %v382_v59 = vrot.slane %v325_v51, %v381_v58  ;;  %v401_v61 = vrot.slane %v325_v51, %v400_v60  ;;  %v458_v63 = vrot.slane %v325_v51, %v457_v62  ;;  %v477_v1 = vrot.slane %v325_v51, %v476_v0 }
 0x210   :  { %365 = vbcast.lane.b32.xlu0 %v363_v52, 256  ;;  %346 = vbcast.lane.b32.xlu1 %v344_v53, 256 }
 0x214   :  { %422 = vbcast.lane.b32.xlu0 %v420_v55, 256  ;;  %350 = vbcast.lane.b32.xlu1 %v344_v53, 264 }
 0x218   :  { %430 = vbcast.lane.b32.xlu0 %v420_v55, 272  ;;  %354 = vbcast.lane.b32.xlu1 %v344_v53, 272 }
 0x21c   :  { %441 = vbcast.lane.b32.xlu0 %v439_v57, 256  ;;  %358 = vbcast.lane.b32.xlu1 %v344_v53, 280 }
 0x21d   :  { %v3352_v7 = vpop.trf.xlu0 }
 0x21e   :  { %v533_v9 = vrot.slane %v3352_v7, %v3350_v6 }
 0x220   :  { %449 = vbcast.lane.b32.xlu0 %v439_v57, 272  ;;  %369 = vbcast.lane.b32.xlu1 %v363_v52, 264  ;;  %v549_v10 = vrot.slane %v533_v9, %v3350_v6  ;;  %v541_v19 = vcombine.high %v533_v9, %v533_v9 }
 0x222   :  { %v578_v12 = vrot.slane %v549_v10, %v3345_v50  ;;  %v3365_v22 = vrot.slane %v541_v19, %v3350_v6  ;;  %v571_v30 = vcombine.high %v549_v10, %v549_v10 }
 0x224   :  { %373 = vbcast.lane.b32.xlu1 %v363_v52, 272  ;;  %v582_v26 = vrot.slane %v3365_v22, %v3345_v50  ;;  %v586_v41 = vrot.slane %v571_v30, %v3345_v50 }
 0x228   :  { %377 = vbcast.lane.b32.xlu1 %v363_v52, 280 }
 0x22c   :  { %384 = vbcast.lane.b32.xlu1 %v382_v59, 256 }
 0x230   :  { %388 = vbcast.lane.b32.xlu1 %v382_v59, 264 }
 0x234   :  { %392 = vbcast.lane.b32.xlu1 %v382_v59, 272 }
 0x238   :  { %396 = vbcast.lane.b32.xlu1 %v382_v59, 280 }
 0x23c   :  { %403 = vbcast.lane.b32.xlu1 %v401_v61, 256 }
 0x240   :  { %407 = vbcast.lane.b32.xlu1 %v401_v61, 264 }
 0x244   :  { %411 = vbcast.lane.b32.xlu1 %v401_v61, 272 }
 0x248   :  { %415 = vbcast.lane.b32.xlu1 %v401_v61, 280  ;;  %v526_v61 = vcombine.high %v3352_v7, %v3352_v7 }
 0x24a   :  { %v540_v9 = vrot.slane %v526_v61, %v3350_v6 }
 0x24c   :  { %426 = vbcast.lane.b32.xlu1 %v420_v55, 264 }
 0x250   :  { %434 = vbcast.lane.b32.xlu1 %v420_v55, 280 }
 0x254   :  { %445 = vbcast.lane.b32.xlu1 %v439_v57, 264 }
 0x258   :  { %453 = vbcast.lane.b32.xlu1 %v439_v57, 280 }
 0x25c   :  { %460 = vbcast.lane.b32.xlu1 %v458_v63, 256 }
 0x260   :  { %464 = vbcast.lane.b32.xlu1 %v458_v63, 264 }
 0x264   :  { %468 = vbcast.lane.b32.xlu1 %v458_v63, 272 }
 0x268   :  { %472 = vbcast.lane.b32.xlu1 %v458_v63, 280 }
 0x26c   :  { %479 = vbcast.lane.b32.xlu1 %v477_v1, 256 }
 0x270   :  { %483 = vbcast.lane.b32.xlu1 %v477_v1, 264 }
 0x274   :  { %487 = vbcast.lane.b32.xlu1 %v477_v1, 272 }
 0x278   :  { %491 = vbcast.lane.b32.xlu1 %v477_v1, 280 }
 0x282   :  { %v347_v11 = vpop.permute.xlu1 %346  ;;  %v366_v38 = vpop.permute.xlu0 %365 }
 0x283   :  { %v615_v21 = vadd.f32 %v578_v12, %v347_v11  ;;  %v619_v47 = vadd.f32 %v582_v26, %v366_v38 }
 0x285   :  { %v679_v25 = vmul.f32 0.2, %v615_v21  ;;  %vm647_vm4 = vcmp.gt.f32.partialorder %v615_v21, 0.0  ;;  %v683_v58 = vmul.f32 0.2, %v619_v47  ;;  %vm651_vm9 = vcmp.gt.f32.partialorder %v619_v47, 0.0 }
 0x286   :  { %v351_v13 = vpop.permute.xlu1 %350 }
 0x287   :  { %v616_v14 = vadd.f32 %v578_v12, %v351_v13  ;;  %v3369_v36 = vsel %vm647_vm4, %v615_v21, %v679_v25  ;;  %v3392_v2 = vsel %vm651_vm9, %v619_v47, %v683_v58  ;;  %v423_v21 = vpop.permute.xlu0 %422 }
 0x288   :  { %v744_v42 = vsel %vm743_vm3, %v3369_v36, -inf  ;;  %v756_v7 = vsel %vm743_vm3, %v3392_v2, -inf }
 0x289   :  { %vm648_vm2 = vcmp.gt.f32.partialorder %v616_v14, 0.0  ;;  %v680_v15 = vmul.f32 0.2, %v616_v14 }
 0x28a   :  { %v355_v16 = vpop.permute.xlu1 %354 }
 0x28b   :  { %v3360_v17 = vsel %vm648_vm2, %v616_v14, %v680_v15  ;;  %v617_v24 = vadd.f32 %v578_v12, %v355_v16  ;;  %v573_v14 = vcombine.high %v3365_v22, %v3365_v22 }
 0x28c   :  { %v747_v18 = vsel %vm743_vm3, %v3360_v17, -inf }
 0x28d   :  { %748 = vmax.xlane.f32.xlu0 %v747_v18  ;;  %v681_v37 = vmul.f32 0.2, %v617_v24  ;;  %vm649_vm6 = vcmp.gt.f32.partialorder %v617_v24, 0.0  ;;  %v3402_v18 = vrot.slane %v540_v9, %v3350_v6 }
 0x28e   :  { %v359_v20 = vpop.permute.xlu1 %358 }
 0x28f   :  { %v618_v35 = vadd.f32 %v578_v12, %v359_v20  ;;  %v3378_v51 = vsel %vm649_vm6, %v617_v24, %v681_v37 }
 0x290   :  { %v750_v55 = vsel %vm743_vm3, %v3378_v51, -inf }
 0x291   :  { %v682_v52 = vmul.f32 0.2, %v618_v35  ;;  %vm650_vm7 = vcmp.gt.f32.partialorder %v618_v35, 0.0 }
 0x292   :  { %v370_v23 = vpop.permute.xlu1 %369 }
 0x293   :  { %v620_v56 = vadd.f32 %v582_v26, %v370_v23  ;;  %v3382_v57 = vsel %vm650_vm7, %v618_v35, %v682_v52  ;;  %v594_v35 = vrot.slane %v3402_v18, %v3345_v50 }
 0x294   :  { %v753_v62 = vsel %vm743_vm3, %v3382_v57, -inf }
 0x295   :  { %v684_v3 = vmul.f32 0.2, %v620_v56  ;;  %vm652_vm10 = vcmp.gt.f32.partialorder %v620_v56, 0.0 }
 0x296   :  { %v374_v27 = vpop.permute.xlu1 %373 }
 0x297   :  { %v621_v34 = vadd.f32 %v582_v26, %v374_v27  ;;  %v3397_v12 = vsel %vm652_vm10, %v620_v56, %v684_v3 }
 0x298   :  { %v759_v19 = vsel %vm743_vm3, %v3397_v12, -inf }
 0x299   :  { %vm653_vm5 = vcmp.gt.f32.partialorder %v621_v34, 0.0  ;;  %v685_v39 = vmul.f32 0.2, %v621_v34 }
 0x29a   :  { %v378_v40 = vpop.permute.xlu1 %377 }
 0x29b   :  { %v3374_v45 = vsel %vm653_vm5, %v621_v34, %v685_v39  ;;  %v622_v0 = vadd.f32 %v582_v26, %v378_v40  ;;  %v590_v26 = vrot.slane %v573_v14, %v3345_v50  ;;  %v542_v39 = vcombine.high %v540_v9, %v540_v9 }
 0x29c   :  { %745 = vmax.xlane.f32.xlu1 %v744_v42  ;;  %v762_v49 = vsel %vm743_vm3, %v3374_v45, -inf }
 0x29d   :  { %763 = vmax.xlane.f32.xlu0 %v762_v49  ;;  %v686_v13 = vmul.f32 0.2, %v622_v0  ;;  %vm654_vm12 = vcmp.gt.f32.partialorder %v622_v0, 0.0  ;;  %v3428_v56 = vrot.slane %v542_v39, %v3350_v6 }
 0x29e   :  { %v385_v53 = vpop.permute.xlu1 %384 }
 0x29f   :  { %v623_v54 = vadd.f32 %v586_v41, %v385_v53  ;;  %v3410_v25 = vsel %vm654_vm12, %v622_v0, %v686_v13  ;;  %v631_v53 = vadd.f32 %v594_v35, %v423_v21 }
 0x2a0   :  { %751 = vmax.xlane.f32.xlu1 %v750_v55  ;;  %v765_v34 = vsel %vm743_vm3, %v3410_v25, -inf }
 0x2a1   :  { %vm655_vm8 = vcmp.gt.f32.partialorder %v623_v54, 0.0  ;;  %v687_v59 = vmul.f32 0.2, %v623_v54  ;;  %v695_v3 = vmul.f32 0.2, %v631_v53  ;;  %vm663_vm4 = vcmp.gt.f32.partialorder %v631_v53, 0.0 }
 0x2a2   :  { %v389_v60 = vpop.permute.xlu1 %388 }
 0x2a3   :  { %v3388_v63 = vsel %vm655_vm8, %v623_v54, %v687_v59  ;;  %v624_v11 = vadd.f32 %v586_v41, %v389_v60  ;;  %v3442_v14 = vsel %vm663_vm4, %v631_v53, %v695_v3 }
 0x2a4   :  { %754 = vmax.xlane.f32.xlu1 %v753_v62  ;;  %v768_v1 = vsel %vm743_vm3, %v3388_v63, -inf }
 0x2a5   :  { %769 = vmax.xlane.f32.xlu0 %v768_v1  ;;  %v688_v22 = vmul.f32 0.2, %v624_v11  ;;  %vm656_vm13 = vcmp.gt.f32.partialorder %v624_v11, 0.0 }
 0x2a6   :  { %v393_v4 = vpop.permute.xlu1 %392 }
 0x2a7   :  { %v625_v10 = vadd.f32 %v586_v41, %v393_v4  ;;  %v3417_v37 = vsel %vm656_vm13, %v624_v11, %v688_v22  ;;  %v598_v4 = vrot.slane %v3428_v56, %v3345_v50 }
 0x2a8   :  { %757 = vmax.xlane.f32.xlu1 %v756_v7  ;;  %v771_v49 = vsel %vm743_vm3, %v3417_v37, -inf }
 0x2a9   :  { %vm657_vm11 = vcmp.gt.f32.partialorder %v625_v10, 0.0  ;;  %v689_v15 = vmul.f32 0.2, %v625_v10 }
 0x2aa   :  { %v397_v16 = vpop.permute.xlu1 %396 }
 0x2ab   :  { %v3406_v20 = vsel %vm657_vm11, %v625_v10, %v689_v15  ;;  %v626_v23 = vadd.f32 %v586_v41, %v397_v16  ;;  %v431_v41 = vpop.permute.xlu0 %430 }
 0x2ac   :  { %760 = vmax.xlane.f32.xlu1 %v759_v19  ;;  %v774_v24 = vsel %vm743_vm3, %v3406_v20, -inf  ;;  %v633_v62 = vadd.f32 %v594_v35, %v431_v41 }
 0x2ad   :  { %775 = vmax.xlane.f32.xlu0 %v774_v24  ;;  %v690_v38 = vmul.f32 0.2, %v626_v23  ;;  %vm658_vm15 = vcmp.gt.f32.partialorder %v626_v23, 0.0 }
 0x2ae   :  { %v404_v27 = vpop.permute.xlu1 %403  ;;  %v697_v15 = vmul.f32 0.2, %v633_v62  ;;  %vm665_vm6 = vcmp.gt.f32.partialorder %v633_v62, 0.0 }
 0x2af   :  { %v627_v30 = vadd.f32 %v590_v26, %v404_v27  ;;  %v3425_v55 = vsel %vm658_vm15, %v626_v23, %v690_v38  ;;  %v442_v0 = vpop.permute.xlu0 %441  ;;  %v792_v27 = vsel %vm743_vm3, %v3442_v14, -inf }
 0x2b0   :  { %766 = vmax.xlane.f32.xlu1 %v765_v34  ;;  %v777_v61 = vsel %vm743_vm3, %v3425_v55, -inf  ;;  %v635_v16 = vadd.f32 %v598_v4, %v442_v0  ;;  %v572_v0 = vcombine.high %v3402_v18, %v3402_v18 }
 0x2b1   :  { %vm659_vm14 = vcmp.gt.f32.partialorder %v627_v30, 0.0  ;;  %v691_v40 = vmul.f32 0.2, %v627_v30 }
 0x2b2   :  { %v408_v42 = vpop.permute.xlu1 %407  ;;  %v699_v39 = vmul.f32 0.2, %v635_v16  ;;  %vm667_vm8 = vcmp.gt.f32.partialorder %v635_v16, 0.0  ;;  %v602_v18 = vrot.slane %v572_v0, %v3345_v50 }
 0x2b3   :  { %v628_v47 = vadd.f32 %v590_v26, %v408_v42  ;;  %v3421_v52 = vsel %vm659_vm14, %v627_v30, %v691_v40  ;;  %v450_v21 = vpop.permute.xlu0 %449  ;;  %v3450_v30 = vsel %vm665_vm6, %v633_v62, %v697_v15 }
 0x2b4   :  { %772 = vmax.xlane.f32.xlu1 %v771_v49  ;;  %v780_v54 = vsel %vm743_vm3, %v3421_v52, -inf  ;;  %v637_v34 = vadd.f32 %v598_v4, %v450_v21  ;;  %v798_v49 = vsel %vm743_vm3, %v3450_v30, -inf }
 0x2b5   :  { %781 = vmax.xlane.f32.xlu0 %v780_v54  ;;  %vm660_vm0 = vcmp.gt.f32.partialorder %v628_v47, 0.0  ;;  %v692_v58 = vmul.f32 0.2, %v628_v47  ;;  %v3458_v54 = vsel %vm667_vm8, %v635_v16, %v699_v39 }
 0x2b6   :  { %v412_v59 = vpop.permute.xlu1 %411  ;;  %vm669_vm10 = vcmp.gt.f32.partialorder %v637_v34, 0.0  ;;  %v804_v62 = vsel %vm743_vm3, %v3458_v54, -inf }
 0x2b7   :  { %v629_v60 = vadd.f32 %v590_v26, %v412_v59  ;;  %v3432_v1 = vsel %vm660_vm0, %v628_v47, %v692_v58  ;;  %v701_v58 = vmul.f32 0.2, %v637_v34 }
 0x2b8   :  { %778 = vmax.xlane.f32.xlu1 %v777_v61  ;;  %v783_v7 = vsel %vm743_vm3, %v3432_v1, -inf }
 0x2b9   :  { %vm661_vm2 = vcmp.gt.f32.partialorder %v629_v60, 0.0  ;;  %v693_v6 = vmul.f32 0.2, %v629_v60 }
 0x2ba   :  { %v416_v9 = vpop.permute.xlu1 %415 }
 0x2bb   :  { %v630_v10 = vadd.f32 %v590_v26, %v416_v9  ;;  %v3438_v11 = vsel %vm661_vm2, %v629_v60, %v693_v6  ;;  %v3468_v6 = vsel %vm669_vm10, %v637_v34, %v701_v58 }
 0x2bc   :  { %784 = vmax.xlane.f32.xlu1 %v783_v7  ;;  %v786_v13 = vsel %vm743_vm3, %v3438_v11, -inf  ;;  %v810_v15 = vsel %vm743_vm3, %v3468_v6, -inf }
 0x2bd   :  { %787 = vmax.xlane.f32.xlu0 %v786_v13  ;;  %vm662_vm5 = vcmp.gt.f32.partialorder %v630_v10, 0.0  ;;  %v694_v19 = vmul.f32 0.2, %v630_v10 }
 0x2be   :  { %v427_v23 = vpop.permute.xlu1 %426 }
 0x2bf   :  { %v632_v24 = vadd.f32 %v594_v35, %v427_v23  ;;  %v3444_v22 = vsel %vm662_vm5, %v630_v10, %v694_v19 }
 0x2c0   :  { %v789_v26 = vsel %vm743_vm3, %v3444_v22, -inf }
 0x2c1   :  { %790 = vmax.xlane.f32.xlu1 %v789_v26  ;;  %793 = vmax.xlane.f32.xlu0 %v792_v27  ;;  %vm664_vm7 = vcmp.gt.f32.partialorder %v632_v24, 0.0  ;;  %v696_v38 = vmul.f32 0.2, %v632_v24 }
 0x2c2   :  { %v435_v40 = vpop.permute.xlu1 %434 }
 0x2c3   :  { %v634_v41 = vadd.f32 %v594_v35, %v435_v40  ;;  %v3452_v42 = vsel %vm664_vm7, %v632_v24, %v696_v38 }
 0x2c4   :  { %v795_v47 = vsel %vm743_vm3, %v3452_v42, -inf }
 0x2c5   :  { %796 = vmax.xlane.f32.xlu1 %v795_v47  ;;  %799 = vmax.xlane.f32.xlu0 %v798_v49  ;;  %vm666_vm9 = vcmp.gt.f32.partialorder %v634_v41, 0.0  ;;  %v698_v53 = vmul.f32 0.2, %v634_v41 }
 0x2c6   :  { %v446_v59 = vpop.permute.xlu1 %445 }
 0x2c7   :  { %v636_v60 = vadd.f32 %v598_v4, %v446_v59  ;;  %v3460_v61 = vsel %vm666_vm9, %v634_v41, %v698_v53  ;;  %v574_v53 = vcombine.high %v3428_v56, %v3428_v56 }
 0x2c8   :  { %v801_v35 = vsel %vm743_vm3, %v3460_v61, -inf }
 0x2c9   :  { %802 = vmax.xlane.f32.xlu1 %v801_v35  ;;  %805 = vmax.xlane.f32.xlu0 %v804_v62  ;;  %vm668_vm11 = vcmp.gt.f32.partialorder %v636_v60, 0.0  ;;  %v700_v3 = vmul.f32 0.2, %v636_v60 }
 0x2ca   :  { %v454_v9 = vpop.permute.xlu1 %453 }
 0x2cb   :  { %v638_v10 = vadd.f32 %v598_v4, %v454_v9  ;;  %v3470_v7 = vsel %vm668_vm11, %v636_v60, %v700_v3  ;;  %v606_v3 = vrot.slane %v574_v53, %v3345_v50 }
 0x2cc   :  { %v807_v13 = vsel %vm743_vm3, %v3470_v7, -inf }
 0x2cd   :  { %808 = vmax.xlane.f32.xlu1 %v807_v13  ;;  %811 = vmax.xlane.f32.xlu0 %v810_v15  ;;  %vm670_vm12 = vcmp.gt.f32.partialorder %v638_v10, 0.0  ;;  %v702_v16 = vmul.f32 0.2, %v638_v10 }
 0x2ce   :  { %v461_v19 = vpop.permute.xlu1 %460 }
 0x2cf   :  { %v639_v21 = vadd.f32 %v602_v18, %v461_v19  ;;  %v3477_v23 = vsel %vm670_vm12, %v638_v10, %v702_v16 }
 0x2d0   :  { %v813_v4 = vsel %vm743_vm3, %v3477_v23, -inf }
 0x2d1   :  { %814 = vmax.xlane.f32.xlu1 %v813_v4  ;;  %vm671_vm13 = vcmp.gt.f32.partialorder %v639_v21, 0.0  ;;  %v703_v24 = vmul.f32 0.2, %v639_v21 }
 0x2d2   :  { %v465_v26 = vpop.permute.xlu1 %464 }
 0x2d3   :  { %v640_v27 = vadd.f32 %v602_v18, %v465_v26  ;;  %v3481_v34 = vsel %vm671_vm13, %v639_v21, %v703_v24 }
 0x2d4   :  { %v816_v38 = vsel %vm743_vm3, %v3481_v34, -inf }
 0x2d5   :  { %817 = vmax.xlane.f32.xlu0 %v816_v38  ;;  %vm672_vm14 = vcmp.gt.f32.partialorder %v640_v27, 0.0  ;;  %v704_v39 = vmul.f32 0.2, %v640_v27 }
 0x2d6   :  { %v469_v40 = vpop.permute.xlu1 %468 }
 0x2d7   :  { %v641_v41 = vadd.f32 %v602_v18, %v469_v40  ;;  %v3485_v47 = vsel %vm672_vm14, %v640_v27, %v704_v39 }
 0x2d8   :  { %v819_v49 = vsel %vm743_vm3, %v3485_v47, -inf }
 0x2d9   :  { %820 = vmax.xlane.f32.xlu1 %v819_v49  ;;  %vm673_vm15 = vcmp.gt.f32.partialorder %v641_v41, 0.0  ;;  %v705_v58 = vmul.f32 0.2, %v641_v41 }
 0x2da   :  { %v473_v59 = vpop.permute.xlu1 %472 }
 0x2db   :  { %v642_v60 = vadd.f32 %v602_v18, %v473_v59  ;;  %v3491_v35 = vsel %vm673_vm15, %v641_v41, %v705_v58 }
 0x2dc   :  { %v822_v62 = vsel %vm743_vm3, %v3491_v35, -inf }
 0x2dd   :  { %v706_v0 = vmul.f32 0.2, %v642_v60  ;;  %823 = vmax.xlane.f32.xlu0 %v822_v62  ;;  %vm674_vm0 = vcmp.gt.f32.partialorder %v642_v60, 0.0  ;;  %v3523_v62 = vld [vmem:[%s4014_s5] ss:$0 sm:$0xff] }
 0x2de   :  { %v480_v9 = vpop.permute.xlu1 %479 }
 0x2df   :  { %v643_v10 = vadd.f32 %v606_v3, %v480_v9  ;;  %v3496_v13 = vsel %vm674_vm0, %v642_v60, %v706_v0 }
 0x2e0   :  { %v825_v56 = vsel %vm743_vm3, %v3496_v13, -inf }
 0x2e1   :  { %826 = vmax.xlane.f32.xlu1 %v825_v56  ;;  %vm675_vm2 = vcmp.gt.f32.partialorder %v643_v10, 0.0  ;;  %v707_v15 = vmul.f32 0.2, %v643_v10 }
 0x2e2   :  { %v484_v18 = vpop.permute.xlu1 %483 }
 0x2e3   :  { %v644_v16 = vadd.f32 %v606_v3, %v484_v18  ;;  %v3500_v19 = vsel %vm675_vm2, %v643_v10, %v707_v15 }
 0x2e4   :  { %v828_v21 = vsel %vm743_vm3, %v3500_v19, -inf }
 0x2e5   :  { %v708_v4 = vmul.f32 0.2, %v644_v16  ;;  %829 = vmax.xlane.f32.xlu0 %v828_v21  ;;  %vm676_vm4 = vcmp.gt.f32.partialorder %v644_v16, 0.0 }
 0x2e6   :  { %v488_v24 = vpop.permute.xlu1 %487 }
 0x2e7   :  { %v645_v26 = vadd.f32 %v606_v3, %v488_v24  ;;  %v3504_v27 = vsel %vm676_vm4, %v644_v16, %v708_v4 }
 0x2e8   :  { %v831_v38 = vsel %vm743_vm3, %v3504_v27, -inf }
 0x2e9   :  { %832 = vmax.xlane.f32.xlu1 %v831_v38  ;;  %vm677_vm5 = vcmp.gt.f32.partialorder %v645_v26, 0.0  ;;  %v709_v39 = vmul.f32 0.2, %v645_v26 }
 0x2ea   :  { %v492_v40 = vpop.permute.xlu1 %491 }
 0x2eb   :  { %v646_v41 = vadd.f32 %v606_v3, %v492_v40  ;;  %v3508_v49 = vsel %vm677_vm5, %v645_v26, %v709_v39 }
 0x2ec   :  { %v834_v53 = vsel %vm743_vm3, %v3508_v49, -inf }
 0x2ed   :  { %v710_v58 = vmul.f32 0.2, %v646_v41  ;;  %835 = vmax.xlane.f32.xlu0 %v834_v53  ;;  %vm678_vm6 = vcmp.gt.f32.partialorder %v646_v41, 0.0 }
 0x2ef   :  { %v3512_v59 = vsel %vm678_vm6, %v646_v41, %v710_v58 }
 0x2f0   :  { %v837_v60 = vsel %vm743_vm3, %v3512_v59, -inf }
 0x2f1   :  { %838 = vmax.xlane.f32.xlu1 %v837_v60 }
 0x302   :  { %1921 = vrot.lane.b32.xlu1 %v3300_v28, %s3169_s15 }
 0x303   :  { %1802 = vrot.lane.b32.xlu0 %v3300_v28, %s3168_s14 }
 0x306   :  { %1391 = vrot.lane.b32.xlu1 %v3523_v62, %s3163_s4 }
 0x307   :  { %1272 = vrot.lane.b32.xlu0 %v3523_v62, %s3164_s3 }
 0x30a   :  { %1510 = vrot.lane.b32.xlu1 %v3523_v62, %s3165_s11 }
 0x30b   :  { %1748 = vrot.lane.b32.xlu0 %v3523_v62, %s3167_s13 }
 0x30e   :  { %1629 = vrot.lane.b32.xlu1 %v3523_v62, %s3166_s12  ;;  %s3177_s12 = smov 56  }
 0x316   :  { %v749_v28 = vpop.xlane.xlu0 %748 }
 0x317   :  { %v841_v0 = vsub.f32 %v3360_v17, %v749_v28 }
 0x319   :  { %v874_v3 = vmul.f32 1.442695, %v841_v0 }
 0x31b   :  { %2938 = vpow2.f32 %v874_v3 }
 0x325   :  { %v746_v9 = vpop.xlane.xlu1 %745 }
 0x326   :  { %v840_v10 = vsub.f32 %v3369_v36, %v746_v9  ;;  %v764_v18 = vpop.xlane.xlu0 %763  ;;  %v2680_v36 = vld [vmem:[%s4015_s1] sm:$0xff]  }
 0x327   :  { %v846_v4 = vsub.f32 %v3374_v45, %v764_v18  ;;  %v3546_v58 = vunpack.c.h.bf16 %v2680_v36 }
 0x328   :  { %v872_v56 = vmul.f32 1.442695, %v840_v10  ;;  %v2939_v45 = vpop.eup %2938 }
 0x329   :  { %v752_v15 = vpop.xlane.xlu1 %751  ;;  %v884_v17 = vmul.f32 1.442695, %v846_v4 }
 0x32a   :  { %2940 = vpow2.f32 %v872_v56  ;;  %v842_v16 = vsub.f32 %v3378_v51, %v752_v15  ;;  %v3544_v51 = vunpack.c.l.bf16 %v2680_v36 }
 0x32c   :  { %v876_v21 = vmul.f32 1.442695, %v842_v16 }
 0x32d   :  { %v755_v24 = vpop.xlane.xlu1 %754 }
 0x32e   :  { %v843_v26 = vsub.f32 %v3382_v57, %v755_v24  ;;  %2942 = vpow2.f32 %v876_v21  ;;  %v770_v40 = vpop.xlane.xlu0 %769 }
 0x32f   :  { %v848_v57 = vsub.f32 %v3388_v63, %v770_v40 }
 0x330   :  { %v878_v38 = vmul.f32 1.442695, %v843_v26 }
 0x331   :  { %v758_v39 = vpop.xlane.xlu1 %757  ;;  %v888_v56 = vmul.f32 1.442695, %v848_v57 }
 0x332   :  { %2944 = vpow2.f32 %v878_v38  ;;  %v844_v41 = vsub.f32 %v3392_v2, %v758_v39  ;;  %v3554_v2 = vmul.f32 %v2939_v45, %v3546_v58 }
 0x333   :  { %2946 = vpow2.f32 %v884_v17 }
 0x334   :  { %v880_v53 = vmul.f32 1.442695, %v844_v41 }
 0x335   :  { %v761_v60 = vpop.xlane.xlu1 %760 }
 0x336   :  { %2948 = vpow2.f32 %v880_v53  ;;  %v845_v28 = vsub.f32 %v3397_v12, %v761_v60  ;;  %v776_v0 = vpop.xlane.xlu0 %775  ;;  %v2687_v12 = vld [vmem:[%s4015_s1 + $0x8] sm:$0xff]   ;;  %s3171_s1 = smov 8  }
 0x337   :  { %v2941_v3 = vpop.eup %2940  ;;  %v850_v15 = vsub.f32 %v3406_v20, %v776_v0  ;;  %v3563_v21 = vunpack.c.h.bf16 %v2687_v12  ;;  %v3566_v38 = vunpack.c.l.bf16 %v2687_v12 }
 0x338   :  { %v882_v9 = vmul.f32 1.442695, %v845_v28  ;;  %v3551_v10 = vmul.f32 %v2941_v3, %v3544_v51 }
 0x339   :  { %v767_v18 = vpop.xlane.xlu1 %766  ;;  %v892_v26 = vmul.f32 1.442695, %v850_v15 }
 0x33a   :  { %2950 = vpow2.f32 %v882_v9  ;;  %v847_v63 = vsub.f32 %v3410_v25, %v767_v18  ;;  %v1101_v16 = vpack.c.bf16 %v3554_v2, %v3551_v10 }
 0x33b   :  { %v2943_v24 = vpop.eup %2942  ;;  %2952 = vpow2.f32 %v888_v56 }
 0x33c   :  { %v886_v4 = vmul.f32 1.442695, %v847_v63  ;;  %2821 = vmatprep.mubr.msk.bf16.mxu1 %vm743_vm3, %v1101_v16  ;;  %v3571_v40 = vmul.f32 %v2943_v24, %v3566_v38 }
 0x33d   :  { %v773_v20 = vpop.xlane.xlu1 %772 }
 0x33e   :  { %2954 = vpow2.f32 %v886_v4  ;;  %v849_v25 = vsub.f32 %v3417_v37, %v773_v20  ;;  %v782_v17 = vpop.xlane.xlu0 %781 }
 0x33f   :  { %v2945_v39 = vpop.eup %2944  ;;  %v852_v36 = vsub.f32 %v3421_v52, %v782_v17  ;;  %2956 = vpow2.f32 %v892_v26 }
 0x340   :  { %v3574_v41 = vmul.f32 %v2945_v39, %v3563_v21  ;;  %v890_v53 = vmul.f32 1.442695, %v849_v25  ;;  %v2947_v60 = vpop.eup %2946 }
 0x341   :  { %v896_v45 = vmul.f32 1.442695, %v852_v36  ;;  %v779_v57 = vpop.xlane.xlu1 %778  ;;  %v946_v18 = vmul.f32 %v2947_v60, %v3566_v38 }
 0x342   :  { %2958 = vpow2.f32 %v890_v53  ;;  %v851_v28 = vsub.f32 %v3425_v55, %v779_v57  ;;  %v1102_v37 = vpack.c.bf16 %v3574_v41, %v3571_v40 }
 0x343   :  { %v2949_v0 = vpop.eup %2948  ;;  %2960 = vpow2.f32 %v896_v45  ;;  %v990_v17 = vsel %vm743_vm3, %v946_v18, 0.0 }
 0x344   :  { %v894_v3 = vmul.f32 1.442695, %v851_v28  ;;  %2822 = vmatmul.mubr.msk.bf16.vlgmr.msra.gmra.mxu1 %vm743_vm3, %v1102_v37  ;;  %v944_v52 = vmul.f32 %v2949_v0, %v3544_v51 }
 0x345   :  { %2834 = vmatpush3.bf16.msra.mxu1 %v3327_v29  ;;  %v785_v9 = vpop.xlane.xlu1 %784 }
 0x346   :  { %2962 = vpow2.f32 %v894_v3  ;;  %v853_v56 = vsub.f32 %v3432_v1, %v785_v9  ;;  %2835 = vmatprep.subr.bf16.mxu1 %v3341_v46  ;;  %v788_v15 = vpop.xlane.xlu0 %787  ;;  %v984_v55 = vsel %vm743_vm3, %v944_v52, 0.0 }
 0x347   :  { %v2951_v63 = vpop.eup %2950  ;;  %v854_v16 = vsub.f32 %v3438_v11, %v788_v15  ;;  %985 = vadd.xlane.f32.xlu0 %v984_v55 }
 0x348   :  { %v898_v12 = vmul.f32 1.442695, %v853_v56  ;;  %v945_v4 = vmul.f32 %v2951_v63, %v3546_v58  ;;  %v2953_v29 = vpop.eup %2952 }
 0x349   :  { %v900_v24 = vmul.f32 1.442695, %v854_v16  ;;  %2836 = vmatpush3.bf16.msra.mxu1 %v3341_v46  ;;  %v948_v3 = vmul.f32 %v2953_v29, %v3544_v51 }
 0x34a   :  { %2964 = vpow2.f32 %v898_v12  ;;  %2849 = vmatprep.subr.bf16.mxu1 %v3337_v43  ;;  %v791_v1 = vpop.xlane.xlu1 %790  ;;  %v794_v26 = vpop.xlane.xlu0 %793  ;;  %v987_v20 = vsel %vm743_vm3, %v945_v4, 0.0  ;;  %v1203_v25 = vpack.c.bf16 %v945_v4, %v944_v52 }
 0x34b   :  { %v2955_v39 = vpop.eup %2954  ;;  %2966 = vpow2.f32 %v900_v24  ;;  %v855_v11 = vsub.f32 %v3444_v22, %v791_v1  ;;  %v856_v36 = vsub.f32 %v3442_v14, %v794_v26  ;;  %988 = vadd.xlane.f32.xlu1 %v987_v20  ;;  %991 = vadd.xlane.f32.xlu0 %v990_v17 }
 0x34c   :  { %2829 = vmatprep.mubr.msk.bf16.mxu0 %vm743_vm3, %v1203_v25  ;;  %v947_v46 = vmul.f32 %v2955_v39, %v3563_v21  ;;  %v2957_v57 = vpop.eup %2956 }
 0x34d   :  { %v902_v53 = vmul.f32 1.442695, %v855_v11  ;;  %v904_v45 = vmul.f32 1.442695, %v856_v36  ;;  %v950_v12 = vmul.f32 %v2957_v57, %v3566_v38 }
 0x34e   :  { %v797_v60 = vpop.xlane.xlu1 %796  ;;  %v800_v28 = vpop.xlane.xlu0 %799  ;;  %v993_v37 = vsel %vm743_vm3, %v947_v46, 0.0  ;;  %v1204_v0 = vpack.c.bf16 %v947_v46, %v946_v18 }
 0x34f   :  { %v2959_v52 = vpop.eup %2958  ;;  %2968 = vpow2.f32 %v902_v53  ;;  %v857_v14 = vsub.f32 %v3452_v42, %v797_v60  ;;  %v858_v22 = vsub.f32 %v3450_v30, %v800_v28  ;;  %994 = vadd.xlane.f32.xlu0 %v993_v37  ;;  %v996_v42 = vsel %vm743_vm3, %v948_v3, 0.0 }
 0x350   :  { %2970 = vpow2.f32 %v904_v45  ;;  %2830 = vmatmul.mubr.msk.bf16.vlgmr.msra.gmra.mxu0 %vm743_vm3, %v1204_v0  ;;  %v949_v9 = vmul.f32 %v2959_v52, %v3546_v58  ;;  %v2961_v55 = vpop.eup %2960 }
 0x351   :  { %v906_v56 = vmul.f32 1.442695, %v857_v14  ;;  %v908_v15 = vmul.f32 1.442695, %v858_v22  ;;  %2842 = vmatpush3.bf16.msra.mxu0 %v3330_v31  ;;  %v952_v39 = vmul.f32 %v2961_v55, %v3544_v51 }
 0x352   :  { %2843 = vmatprep.subr.bf16.mxu0 %v3348_v5  ;;  %v803_v18 = vpop.xlane.xlu1 %802  ;;  %v806_v63 = vpop.xlane.xlu0 %805  ;;  %v999_v16 = vsel %vm743_vm3, %v949_v9, 0.0  ;;  %v1324_v30 = vpack.c.bf16 %v949_v9, %v948_v3 }
 0x353   :  { %v2963_v4 = vpop.eup %2962  ;;  %2972 = vpow2.f32 %v906_v56  ;;  %v859_v24 = vsub.f32 %v3460_v61, %v803_v18  ;;  %v860_v29 = vsub.f32 %v3458_v54, %v806_v63  ;;  %1000 = vadd.xlane.f32.xlu1 %v999_v16  ;;  %997 = vadd.xlane.f32.xlu0 %v996_v42  ;;  %v1002_v61 = vsel %vm743_vm3, %v950_v12, 0.0 }
 0x354   :  { %2974 = vpow2.f32 %v908_v15  ;;  %2837 = vmatprep.mubr.msk.bf16.mxu1 %vm743_vm3, %v1324_v30  ;;  %v951_v31 = vmul.f32 %v2963_v4, %v3563_v21 }
 0x355   :  { %v910_v1 = vmul.f32 1.442695, %v859_v24  ;;  %v912_v26 = vmul.f32 1.442695, %v860_v29  ;;  %2844 = vmatpush3.bf16.msra.mxu0 %v3348_v5 }
 0x356   :  { %2857 = vmatprep.subr.bf16.mxu0 %v3332_v32  ;;  %v809_v20 = vpop.xlane.xlu1 %808  ;;  %v812_v25 = vpop.xlane.xlu0 %811  ;;  %v1005_v17 = vsel %vm743_vm3, %v951_v31, 0.0  ;;  %v1325_v54 = vpack.c.bf16 %v951_v31, %v950_v12 }
 0x357   :  { %v2965_v11 = vpop.eup %2964  ;;  %2976 = vpow2.f32 %v910_v1  ;;  %v861_v36 = vsub.f32 %v3470_v7, %v809_v20  ;;  %v862_v46 = vsub.f32 %v3468_v6, %v812_v25  ;;  %1006 = vadd.xlane.f32.xlu1 %v1005_v17  ;;  %1003 = vadd.xlane.f32.xlu0 %v1002_v61  ;;  %v1008_v7 = vsel %vm743_vm3, %v952_v39, 0.0 }
 0x358   :  { %v2967_v5 = vpop.eup %2966  ;;  %2978 = vpow2.f32 %v912_v26  ;;  %2838 = vmatmul.mubr.msk.bf16.vlgmr.msra.gmra.mxu1 %vm743_vm3, %v1325_v54  ;;  %v953_v53 = vmul.f32 %v2965_v11, %v3546_v58 }
 0x359   :  { %v914_v45 = vmul.f32 1.442695, %v861_v36  ;;  %v916_v57 = vmul.f32 1.442695, %v862_v46  ;;  %2850 = vmatpush3.bf16.msra.mxu1 %v3337_v43  ;;  %v954_v37 = vmul.f32 %v2967_v5, %v3566_v38 }
 0x35a   :  { %2851 = vmatprep.subr.bf16.mxu1 %v3343_v48  ;;  %v815_v60 = vpop.xlane.xlu1 %814  ;;  %v1011_v28 = vsel %vm743_vm3, %v953_v53, 0.0  ;;  %v1443_v6 = vpack.c.bf16 %v953_v53, %v952_v39 }
 0x35b   :  { %2980 = vpow2.f32 %v914_v45  ;;  %v863_v0 = vsub.f32 %v3477_v23, %v815_v60  ;;  %1012 = vadd.xlane.f32.xlu1 %v1011_v28  ;;  %1009 = vadd.xlane.f32.xlu0 %v1008_v7  ;;  %v1014_v9 = vsel %vm743_vm3, %v954_v37, 0.0 }
 0x35c   :  { %v2969_v3 = vpop.eup %2968  ;;  %2982 = vpow2.f32 %v916_v57  ;;  %2845 = vmatprep.mubr.msk.bf16.mxu0 %vm743_vm3, %v1443_v6 }
 0x35d   :  { %v2971_v43 = vpop.eup %2970  ;;  %v918_v52 = vmul.f32 1.442695, %v863_v0  ;;  %2852 = vmatpush3.bf16.msra.mxu1 %v3343_v48  ;;  %v955_v14 = vmul.f32 %v2969_v3, %v3563_v21 }
 0x35e   :  { %2865 = vmatprep.subr.bf16.mxu1 %v3339_v44  ;;  %v818_v22 = vpop.xlane.xlu0 %817  ;;  %v956_v56 = vmul.f32 %v2971_v43, %v3544_v51 }
 0x35f   :  { %2984 = vpow2.f32 %v918_v52  ;;  %v864_v23 = vsub.f32 %v3481_v34, %v818_v22  ;;  %1015 = vadd.xlane.f32.xlu0 %v1014_v9  ;;  %v1017_v15 = vsel %vm743_vm3, %v955_v14, 0.0  ;;  %v1444_v55 = vpack.c.bf16 %v955_v14, %v954_v37 }
 0x360   :  { %v2973_v18 = vpop.eup %2972  ;;  %1018 = vadd.xlane.f32.xlu1 %v1017_v15  ;;  %v1020_v30 = vsel %vm743_vm3, %v956_v56, 0.0 }
 0x361   :  { %v2975_v63 = vpop.eup %2974  ;;  %v920_v48 = vmul.f32 1.442695, %v864_v23  ;;  %2846 = vmatmul.mubr.msk.bf16.vlgmr.msra.gmra.mxu0 %vm743_vm3, %v1444_v55  ;;  %v957_v16 = vmul.f32 %v2973_v18, %v3546_v58 }
 0x362   :  { %2858 = vmatpush3.bf16.msra.mxu0 %v3332_v32  ;;  %v821_v42 = vpop.xlane.xlu1 %820  ;;  %v958_v12 = vmul.f32 %v2975_v63, %v3566_v38 }
 0x363   :  { %2986 = vpow2.f32 %v920_v48  ;;  %v865_v34 = vsub.f32 %v3485_v47, %v821_v42  ;;  %2859 = vmatprep.subr.bf16.mxu0 %v3354_v8  ;;  %1021 = vadd.xlane.f32.xlu0 %v1020_v30  ;;  %v1023_v4 = vsel %vm743_vm3, %v957_v16, 0.0  ;;  %v1562_v24 = vpack.c.bf16 %v957_v16, %v956_v56 }
 0x364   :  { %v2977_v29 = vpop.eup %2976  ;;  %1024 = vadd.xlane.f32.xlu1 %v1023_v4  ;;  %v1026_v20 = vsel %vm743_vm3, %v958_v12, 0.0 }
 0x365   :  { %v2979_v31 = vpop.eup %2978  ;;  %v922_v1 = vmul.f32 1.442695, %v865_v34  ;;  %2853 = vmatprep.mubr.msk.bf16.mxu1 %vm743_vm3, %v1562_v24  ;;  %v959_v32 = vmul.f32 %v2977_v29, %v3563_v21 }
 0x366   :  { %2860 = vmatpush3.bf16.msra.mxu0 %v3354_v8  ;;  %v824_v26 = vpop.xlane.xlu0 %823  ;;  %v960_v47 = vmul.f32 %v2979_v31, %v3544_v51 }
 0x367   :  { %2988 = vpow2.f32 %v922_v1  ;;  %2873 = vmatprep.subr.bf16.mxu0 %v3334_v33  ;;  %v866_v25 = vsub.f32 %v3491_v35, %v824_v26  ;;  %1027 = vadd.xlane.f32.xlu0 %v1026_v20  ;;  %v1029_v17 = vsel %vm743_vm3, %v959_v32, 0.0  ;;  %v1563_v61 = vpack.c.bf16 %v959_v32, %v958_v12 }
 0x368   :  { %v2981_v54 = vpop.eup %2980  ;;  %1030 = vadd.xlane.f32.xlu1 %v1029_v17  ;;  %v1032_v46 = vsel %vm743_vm3, %v960_v47, 0.0 }
 0x369   :  { %v2983_v39 = vpop.eup %2982  ;;  %v924_v11 = vmul.f32 1.442695, %v866_v25  ;;  %2854 = vmatmul.mubr.msk.bf16.vlgmr.msra.gmra.mxu1 %vm743_vm3, %v1563_v61  ;;  %v961_v8 = vmul.f32 %v2981_v54, %v3546_v58 }
 0x36a   :  { %2866 = vmatpush3.bf16.msra.mxu1 %v3339_v44  ;;  %v827_v36 = vpop.xlane.xlu1 %826  ;;  %v962_v5 = vmul.f32 %v2983_v39, %v3566_v38 }
 0x36b   :  { %2990 = vpow2.f32 %v924_v11  ;;  %v867_v35 = vsub.f32 %v3496_v13, %v827_v36  ;;  %1033 = vadd.xlane.f32.xlu0 %v1032_v46  ;;  %v1035_v53 = vsel %vm743_vm3, %v961_v8, 0.0  ;;  %v1681_v45 = vpack.c.bf16 %v961_v8, %v960_v47 }
 0x36c   :  { %v2985_v57 = vpop.eup %2984  ;;  %1036 = vadd.xlane.f32.xlu1 %v1035_v53  ;;  %v1038_v7 = vsel %vm743_vm3, %v962_v5, 0.0  ;;  %v975_v36 = vsel %vm743_vm3, %v3554_v2, 0.0  ;;  %v972_v46 = vsel %vm743_vm3, %v3551_v10, 0.0 }
 0x36d   :  { %v926_v60 = vmul.f32 1.442695, %v867_v35  ;;  %2861 = vmatprep.mubr.msk.bf16.mxu0 %vm743_vm3, %v1681_v45  ;;  %v963_v28 = vmul.f32 %v2985_v57, %v3563_v21  ;;  %v981_v35 = vsel %vm743_vm3, %v3574_v41, 0.0 }
 0x36e   :  { %v830_v44 = vpop.xlane.xlu0 %829 }
 0x36f   :  { %2992 = vpow2.f32 %v926_v60  ;;  %v868_v6 = vsub.f32 %v3500_v19, %v830_v44  ;;  %1039 = vadd.xlane.f32.xlu0 %v1038_v7  ;;  %v1041_v13 = vsel %vm743_vm3, %v963_v28, 0.0  ;;  %v1682_v37 = vpack.c.bf16 %v963_v28, %v962_v5 }
 0x370   :  { %v2987_v0 = vpop.eup %2986  ;;  %1042 = vadd.xlane.f32.xlu1 %v1041_v13  ;;  %v978_v5 = vsel %vm743_vm3, %v3571_v40, 0.0 }
 0x371   :  { %v928_v3 = vmul.f32 1.442695, %v868_v6  ;;  %2862 = vmatmul.mubr.msk.bf16.vlgmr.msra.gmra.mxu0 %vm743_vm3, %v1682_v37  ;;  %v964_v43 = vmul.f32 %v2987_v0, %v3544_v51 }
 0x372   :  { %2874 = vmatpush3.bf16.msra.mxu0 %v3334_v33  ;;  %v833_v52 = vpop.xlane.xlu1 %832 }
 0x373   :  { %2994 = vpow2.f32 %v928_v3  ;;  %v869_v14 = vsub.f32 %v3504_v27, %v833_v52  ;;  %v1044_v22 = vsel %vm743_vm3, %v964_v43, 0.0 }
 0x374   :  { %v2989_v19 = vpop.eup %2988  ;;  %1045 = vadd.xlane.f32.xlu0 %v1044_v22 }
 0x375   :  { %v930_v9 = vmul.f32 1.442695, %v869_v14  ;;  %v965_v56 = vmul.f32 %v2989_v19, %v3546_v58 }
 0x376   :  { %v836_v23 = vpop.xlane.xlu0 %835 }
 0x377   :  { %2996 = vpow2.f32 %v930_v9  ;;  %v870_v15 = vsub.f32 %v3508_v49, %v836_v23  ;;  %v1047_v55 = vsel %vm743_vm3, %v965_v56, 0.0  ;;  %v1800_v18 = vpack.c.bf16 %v965_v56, %v964_v43 }
 0x378   :  { %v2991_v63 = vpop.eup %2990  ;;  %1048 = vadd.xlane.f32.xlu1 %v1047_v55 }
 0x379   :  { %v932_v33 = vmul.f32 1.442695, %v870_v15  ;;  %2869 = vmatprep.mubr.msk.bf16.mxu1 %vm743_vm3, %v1800_v18  ;;  %v966_v27 = vmul.f32 %v2991_v63, %v3566_v38 }
 0x37a   :  { %v839_v48 = vpop.xlane.xlu1 %838  ;;  %v1803_v16 = vpop.permute.xlu0 %1802 }
 0x37b   :  { %2998 = vpow2.f32 %v932_v33  ;;  %v871_v42 = vsub.f32 %v3512_v59, %v839_v48  ;;  %2867 = vmatprep.subr.bf16.mxu1 %v1803_v16  ;;  %v1050_v30 = vsel %vm743_vm3, %v966_v27, 0.0 }
 0x37c   :  { %v2993_v12 = vpop.eup %2992  ;;  %1051 = vadd.xlane.f32.xlu0 %v1050_v30  ;;  %2868 = vmatpush3.bf16.msra.mxu1 %v1803_v16 }
 0x37d   :  { %v934_v49 = vmul.f32 1.442695, %v871_v42  ;;  %v967_v34 = vmul.f32 %v2993_v12, %v3563_v21 }
 0x37e   :  { %v1922_v4 = vpop.permute.xlu1 %1921  ;;  %v1273_v53 = vpop.permute.xlu0 %1272 }
 0x37f   :  { %3000 = vpow2.f32 %v934_v49  ;;  %2875 = vmatprep.subr.bf16.mxu0 %v1922_v4  ;;  %v1053_v24 = vsel %vm743_vm3, %v967_v34, 0.0  ;;  %v1801_v29 = vpack.c.bf16 %v967_v34, %v966_v27 }
 0x380   :  { %v2995_v31 = vpop.eup %2994  ;;  %1054 = vadd.xlane.f32.xlu1 %v1053_v24  ;;  %2876 = vmatpush3.bf16.msra.mxu0 %v1922_v4 }
 0x381   :  { %2870 = vmatmul.mubr.msk.bf16.vlgmr.msra.gmra.mxu1 %vm743_vm3, %v1801_v29  ;;  %v968_v59 = vmul.f32 %v2995_v31, %v3544_v51 }
 0x382   :  { %v3699_v45 = vpop.permute.xlu0 %1748 }
 0x383   :  { %v1056_v1 = vsel %vm743_vm3, %v968_v59, 0.0 }
 0x384   :  { %v2997_v32 = vpop.eup %2996  ;;  %1057 = vadd.xlane.f32.xlu0 %v1056_v1 }
 0x385   :  { %v969_v26 = vmul.f32 %v2997_v32, %v3546_v58 }
 0x387   :  { %v1059_v20 = vsel %vm743_vm3, %v969_v26, 0.0  ;;  %v1919_v47 = vpack.c.bf16 %v969_v26, %v968_v59 }
 0x388   :  { %v2999_v25 = vpop.eup %2998  ;;  %1060 = vadd.xlane.f32.xlu1 %v1059_v20 }
 0x389   :  { %2877 = vmatprep.mubr.msk.bf16.mxu0 %vm743_vm3, %v1919_v47  ;;  %v970_v17 = vmul.f32 %v2999_v25, %v3566_v38 }
 0x38b   :  { %v1062_v61 = vsel %vm743_vm3, %v970_v17, 0.0 }
 0x38c   :  { %v3001_v54 = vpop.eup %3000  ;;  %1063 = vadd.xlane.f32.xlu0 %v1062_v61 }
 0x38d   :  { %v971_v39 = vmul.f32 %v3001_v54, %v3563_v21 }
 0x38f   :  { %v1065_v11 = vsel %vm743_vm3, %v971_v39, 0.0  ;;  %v1920_v8 = vpack.c.bf16 %v971_v39, %v970_v17 }
 0x390   :  { %1066 = vadd.xlane.f32.xlu1 %v1065_v11 }
 0x391   :  { %2878 = vmatmul.mubr.msk.bf16.vlgmr.msra.gmra.mxu0 %vm743_vm3, %v1920_v8 }
 0x3a1   :  { %1867 = vrot.lane.b32.xlu1 %v3523_v62, %s3168_s14 }
 0x3a2   :  { %1986 = vrot.lane.b32.xlu0 %v3523_v62, %s3169_s15  ;;  %v3701_v62 = vpop.permute.xlu1 %1391 }
 0x3a6   :  { %v3703_v2 = vpop.permute.xlu1 %1510 }
 0x3aa   :  { %v3705_v28 = vpop.permute.xlu1 %1629 }
 0x3c1   :  { %976 = vadd.xlane.f32.xlu0 %v975_v36 }
 0x3c5   :  { %973 = vadd.xlane.f32.xlu1 %v972_v46  ;;  %979 = vadd.xlane.f32.xlu0 %v978_v5 }
 0x3c9   :  { %982 = vadd.xlane.f32.xlu0 %v981_v35 }
 0x3d0   :  { %v986_v57 = vpop.xlane.xlu0 %985 }
 0x3d4   :  { %v992_v60 = vpop.xlane.xlu0 %991  ;;  %v989_v44 = vpop.xlane.xlu1 %988 }
 0x3d5   :  { %3002 = vrcp.f32 %v992_v60 }
 0x3d6   :  { %3004 = vrcp.f32 %v986_v57 }
 0x3d8   :  { %v995_v10 = vpop.xlane.xlu0 %994 }
 0x3d9   :  { %3006 = vrcp.f32 %v995_v10 }
 0x3da   :  { %3008 = vrcp.f32 %v989_v44 }
 0x3dc   :  { %v998_v40 = vpop.xlane.xlu0 %997  ;;  %v1001_v7 = vpop.xlane.xlu1 %1000 }
 0x3e0   :  { %v1004_v6 = vpop.xlane.xlu0 %1003  ;;  %v1007_v13 = vpop.xlane.xlu1 %1006 }
 0x3e1   :  { %3010 = vrcp.f32 %v1004_v6 }
 0x3e2   :  { %3012 = vrcp.f32 %v998_v40  ;;  %v3003_v22 = vpop.eup %3002 }
 0x3e3   :  { %3014 = vrcp.f32 %v1007_v13  ;;  %v3005_v23 = vpop.eup %3004 }
 0x3e4   :  { %v1010_v41 = vpop.xlane.xlu0 %1009  ;;  %v1013_v37 = vpop.xlane.xlu1 %1012  ;;  %3016 = vrcp.f32 %v1001_v7 }
 0x3e6   :  { %v3007_v33 = vpop.eup %3006 }
 0x3e7   :  { %v3009_v12 = vpop.eup %3008 }
 0x3e8   :  { %v1016_v0 = vpop.xlane.xlu0 %1015 }
 0x3e9   :  { %v1019_v43 = vpop.xlane.xlu1 %1018  ;;  %3018 = vrcp.f32 %v1016_v0 }
 0x3ea   :  { %3020 = vrcp.f32 %v1010_v41 }
 0x3eb   :  { %3022 = vrcp.f32 %v1019_v43 }
 0x3ec   :  { %v1022_v14 = vpop.xlane.xlu0 %1021 }
 0x3ed   :  { %v1025_v9 = vpop.xlane.xlu1 %1024 }
 0x3ee   :  { %v3011_v32 = vpop.eup %3010 }
 0x3ef   :  { %v3013_v25 = vpop.eup %3012 }
 0x3f0   :  { %v1028_v48 = vpop.xlane.xlu0 %1027  ;;  %v3015_v36 = vpop.eup %3014 }
 0x3f1   :  { %v1031_v4 = vpop.xlane.xlu1 %1030  ;;  %v3017_v60 = vpop.eup %3016 }
 0x3f4   :  { %v1034_v54 = vpop.xlane.xlu0 %1033 }
 0x3f5   :  { %v1037_v35 = vpop.xlane.xlu1 %1036 }
 0x3f6   :  { %v3019_v41 = vpop.eup %3018 }
 0x404   :  { %v3707_v3 = vpop.f32.mrf.mxu1 }
 0x406   :  { %v3709_v52 = vpop.f32.mrf.mxu1 }
 0x408   :  { %v3711_v15 = vpop.f32.mrf.mxu1 }
 0x40a   :  { %v3718_v49 = vpop.f32.mrf.mxu1 }
 0x410   :  { %v2831_v19 = vpop.f32.mrf.mxu0 }
 0x411   :  { %v1270_v56 = vmul.f32 %v3003_v22, %v2831_v19  ;;  %v3021_v19 = vpop.eup %3020 }
 0x412   :  { %v1253_v55 = vpop.f32.mrf.mxu0 }
 0x413   :  { %v3713_v18 = vadd.f32 %v1273_v53, %v1270_v56  ;;  %v1268_v63 = vmul.f32 %v3005_v23, %v1253_v55  ;;  %v1043_v56 = vpop.xlane.xlu1 %1042 }
 0x414   :  { %v2832_v27 = vpop.f32.mrf.mxu0 }
 0x415   :  { %v1285_v16 = vmin.f32 %v3713_v18, 0.0  ;;  %v3716_v42 = vadd.f32 %v1273_v53, %v1268_v63  ;;  %v1271_v30 = vmul.f32 %v3007_v33, %v2832_v27  ;;  %vm1281_vm7 = vcmp.gt.f32.partialorder %v3713_v18, 0.0 }
 0x416   :  { %v1256_v34 = vpop.f32.mrf.mxu0 }
 0x417   :  { %v1291_v24 = vmul.f32 1.442695, %v1285_v16  ;;  %v1283_v29 = vmin.f32 %v3716_v42, 0.0  ;;  %v3721_v31 = vadd.f32 %v1273_v53, %v1271_v30  ;;  %v1269_v59 = vmul.f32 %v3009_v12, %v1256_v34 }
 0x418   :  { %v2839_v1 = vpop.f32.mrf.mxu1  ;;  %vm1279_vm8 = vcmp.gt.f32.partialorder %v3716_v42, 0.0 }
 0x419   :  { %3024 = vpow2.f32 %v1291_v24  ;;  %v1287_v26 = vmul.f32 1.442695, %v1283_v29  ;;  %v1286_v20 = vmin.f32 %v3721_v31, 0.0  ;;  %v3724_v47 = vadd.f32 %v1273_v53, %v1269_v59 }
 0x41a   :  { %3026 = vrcp.f32 %v1013_v37  ;;  %v1389_v17 = vmul.f32 %v3011_v32, %v2839_v1  ;;  %v1372_v61 = vpop.f32.mrf.mxu1  ;;  %v1040_v37 = vpop.xlane.xlu0 %1039  ;;  %vm1282_vm10 = vcmp.gt.f32.partialorder %v3721_v31, 0.0 }
 0x41b   :  { %3028 = vpow2.f32 %v1287_v26  ;;  %v1293_v39 = vmul.f32 1.442695, %v1286_v20  ;;  %v1284_v11 = vmin.f32 %v3724_v47, 0.0  ;;  %v1387_v8 = vmul.f32 %v3013_v25, %v1372_v61 }
 0x41c   :  { %3030 = vrcp.f32 %v1028_v48  ;;  %v3728_v46 = vadd.f32 %v3701_v62, %v1389_v17  ;;  %v2840_v5 = vpop.f32.mrf.mxu1  ;;  %v3023_v48 = vpop.eup %3022  ;;  %vm1280_vm9 = vcmp.gt.f32.partialorder %v3724_v47, 0.0 }
 0x41d   :  { %3032 = vpow2.f32 %v1293_v39  ;;  %v1289_v53 = vmul.f32 1.442695, %v1284_v11  ;;  %v1390_v57 = vmul.f32 %v3015_v36, %v2840_v5  ;;  %v3732_v40 = vadd.f32 %v3701_v62, %v1387_v8 }
 0x41e   :  { %3034 = vrcp.f32 %v1022_v14  ;;  %v1404_v10 = vmin.f32 %v3728_v46, 0.0  ;;  %v1375_v44 = vpop.f32.mrf.mxu1  ;;  %v1046_v36 = vpop.xlane.xlu0 %1045  ;;  %vm1400_vm12 = vcmp.gt.f32.partialorder %v3728_v46, 0.0 }
 0x41f   :  { %3036 = vpow2.f32 %v1289_v53  ;;  %v3735_v7 = vadd.f32 %v3701_v62, %v1390_v57  ;;  %v1388_v6 = vmul.f32 %v3017_v60, %v1375_v44  ;;  %v1402_v23 = vmin.f32 %v3732_v40, 0.0 }
 0x420   :  { %3038 = vrcp.f32 %v1031_v4  ;;  %v1410_v13 = vmul.f32 1.442695, %v1404_v10  ;;  %vm1398_vm15 = vcmp.gt.f32.partialorder %v3732_v40, 0.0 }
 0x421   :  { %3040 = vrcp.f32 %v1025_v9  ;;  %v1405_v0 = vmin.f32 %v3735_v7, 0.0  ;;  %v3739_v43 = vadd.f32 %v3701_v62, %v1388_v6  ;;  %v2847_v14 = vpop.f32.mrf.mxu0  ;;  %v1406_v24 = vmul.f32 1.442695, %v1402_v23 }
 0x422   :  { %3042 = vpow2.f32 %v1410_v13  ;;  %v1508_v22 = vmul.f32 %v3019_v41, %v2847_v14  ;;  %vm1401_vm11 = vcmp.gt.f32.partialorder %v3735_v7, 0.0 }
 0x423   :  { %3044 = vrcp.f32 %v1034_v54  ;;  %v1412_v55 = vmul.f32 1.442695, %v1405_v0  ;;  %v1403_v63 = vmin.f32 %v3739_v43, 0.0  ;;  %v1491_v33 = vpop.f32.mrf.mxu0  ;;  %vm1399_vm0 = vcmp.gt.f32.partialorder %v3739_v43, 0.0 }
 0x424   :  { %3046 = vrcp.f32 %v1040_v37  ;;  %v3744_v9 = vadd.f32 %v3703_v2, %v1508_v22  ;;  %v1506_v27 = vmul.f32 %v3021_v19, %v1491_v33 }
 0x425   :  { %3048 = vpow2.f32 %v1412_v55  ;;  %v2848_v62 = vpop.f32.mrf.mxu0  ;;  %v1408_v29 = vmul.f32 1.442695, %v1403_v63 }
 0x426   :  { %v3025_v16 = vpop.eup %3024  ;;  %3050 = vrcp.f32 %v1043_v56  ;;  %v1523_v30 = vmin.f32 %v3744_v9, 0.0  ;;  %v3748_v12 = vadd.f32 %v3703_v2, %v1506_v27  ;;  %v1509_v34 = vmul.f32 %v3023_v48, %v2848_v62  ;;  %v1052_v56 = vpop.xlane.xlu0 %1051 }
 0x427   :  { %v3027_v4 = vpop.eup %3026  ;;  %v1494_v59 = vpop.f32.mrf.mxu0  ;;  %v2622_v1 = vadd.f32 -1.0, %v3025_v16  ;;  %3052 = vrcp.f32 %v1037_v35  ;;  %vm1519_vm13 = vcmp.gt.f32.partialorder %v3744_v9, 0.0 }
 0x428   :  { %v3029_v32 = vpop.eup %3028  ;;  %v1529_v26 = vmul.f32 1.442695, %v1523_v30  ;;  %v1521_v20 = vmin.f32 %v3748_v12, 0.0  ;;  %v3753_v25 = vadd.f32 %v3703_v2, %v1509_v34  ;;  %v1507_v17 = vmul.f32 %v3027_v4, %v1494_v59  ;;  %v1049_v4 = vpop.xlane.xlu1 %1048 }
 0x429   :  { %v3031_v61 = vpop.eup %3030  ;;  %v2855_v54 = vpop.f32.mrf.mxu1  ;;  %v1301_v39 = vsel %vm1281_vm7, %v3713_v18, %v2622_v1  ;;  %v2620_v11 = vadd.f32 -1.0, %v3029_v32  ;;  %vm1517_vm2 = vcmp.gt.f32.partialorder %v3748_v12, 0.0 }
 0x42a   :  { %v3033_v8 = vpop.eup %3032  ;;  %3054 = vpow2.f32 %v1529_v26  ;;  %v1524_v5 = vmin.f32 %v3753_v25, 0.0  ;;  %v3758_v53 = vadd.f32 %v3703_v2, %v1507_v17  ;;  %1311 = vrot.lane.b32.xlu1 %v1301_v39, %s3171_s1  ;;  %v1525_v60 = vmul.f32 1.442695, %v1521_v20 }
 0x42b   :  { %v3035_v57 = vpop.eup %3034  ;;  %3056 = vpow2.f32 %v1406_v24  ;;  %v1627_v10 = vmul.f32 %v3031_v61, %v2855_v54  ;;  %v1610_v35 = vpop.f32.mrf.mxu1  ;;  %v1299_v0 = vsel %vm1279_vm8, %v3716_v42, %v2620_v11  ;;  %v2623_v22 = vadd.f32 -1.0, %v3033_v8 }
 0x42c   :  { %v3037_v18 = vpop.eup %3036  ;;  %3058 = vpow2.f32 %v1408_v29  ;;  %v1531_v44 = vmul.f32 1.442695, %v1524_v5  ;;  %v1522_v6 = vmin.f32 %v3758_v53, 0.0  ;;  %v1625_v13 = vmul.f32 %v3035_v57, %v1610_v35  ;;  %v1055_v8 = vpop.xlane.xlu1 %1054 }
 0x42d   :  { %v3039_v41 = vpop.eup %3038  ;;  %v3764_v2 = vadd.f32 %v3705_v28, %v1627_v10  ;;  %v2856_v37 = vpop.f32.mrf.mxu1  ;;  %v2621_v14 = vadd.f32 -1.0, %v3037_v18  ;;  %v1302_v59 = vsel %vm1282_vm10, %v3721_v31, %v2623_v22  ;;  %vm1520_vm14 = vcmp.gt.f32.partialorder %v3753_v25, 0.0 }
 0x42e   :  { %v3041_v19 = vpop.eup %3040  ;;  %3060 = vpow2.f32 %v1531_v44  ;;  %v1527_v23 = vmul.f32 1.442695, %v1522_v6  ;;  %v1628_v55 = vmul.f32 %v3039_v41, %v2856_v37  ;;  %1307 = vrot.lane.b32.xlu1 %v1299_v0, %s3171_s1  ;;  %v3771_v27 = vadd.f32 %v3705_v28, %v1625_v13 }
 0x42f   :  { %v3043_v63 = vpop.eup %3042  ;;  %3062 = vpow2.f32 %v1525_v60  ;;  %v1642_v33 = vmin.f32 %v3764_v2, 0.0  ;;  %v1613_v48 = vpop.f32.mrf.mxu1  ;;  %v1300_v42 = vsel %vm1280_vm9, %v3724_v47, %v2621_v14  ;;  %vm1518_vm4 = vcmp.gt.f32.partialorder %v3758_v53, 0.0 }
 0x430   :  { %v3045_v62 = vpop.eup %3044  ;;  %3064 = vrcp.f32 %v1046_v36  ;;  %v3775_v16 = vadd.f32 %v3705_v28, %v1628_v55  ;;  %v1626_v30 = vmul.f32 %v3041_v19, %v1613_v48  ;;  %1309 = vrot.lane.b32.xlu0 %v1300_v42, %s3171_s1  ;;  %v2628_v1 = vadd.f32 -1.0, %v3043_v63  ;;  %v3803_v22 = vpop.xlane.xlu1 %1060 }
 0x431   :  { %v3047_v34 = vpop.eup %3046  ;;  %3066 = vrcp.f32 %v1052_v56  ;;  %v1648_v24 = vmul.f32 1.442695, %v1642_v33  ;;  %v2863_v29 = vpop.f32.mrf.mxu0  ;;  %v1640_v61 = vmin.f32 %v3771_v27, 0.0  ;;  %vm1638_vm5 = vcmp.gt.f32.partialorder %v3764_v2, 0.0 }
 0x432   :  { %v3049_v32 = vpop.eup %3048  ;;  %3068 = vpow2.f32 %v1527_v23  ;;  %v1643_v47 = vmin.f32 %v3775_v16, 0.0  ;;  %v3782_v26 = vadd.f32 %v3705_v28, %v1626_v30  ;;  %v1746_v20 = vmul.f32 %v3047_v34, %v2863_v29  ;;  %1313 = vrot.lane.b32.xlu1 %v1302_v59, %s3171_s1  ;;  %v1058_v34 = vpop.xlane.xlu0 %1057 }
 0x433   :  { %v3051_v17 = vpop.eup %3050  ;;  %3070 = vpow2.f32 %v1648_v24  ;;  %v1729_v54 = vpop.f32.mrf.mxu0  ;;  %v2629_v39 = vadd.f32 -1.0, %v3049_v32  ;;  %v1420_v60 = vsel %vm1400_vm12, %v3728_v46, %v2628_v1  ;;  %v1644_v6 = vmul.f32 1.442695, %v1640_v61 }
 0x434   :  { %v1650_v11 = vmul.f32 1.442695, %v1643_v47  ;;  %v3787_v31 = vadd.f32 %v3699_v45, %v1746_v20  ;;  %v1641_v28 = vmin.f32 %v3782_v26, 0.0  ;;  %v1744_v36 = vmul.f32 %v3045_v62, %v1729_v54  ;;  %v3053_v10 = vpop.eup %3052 }
 0x435   :  { %v2864_v5 = vpop.f32.mrf.mxu0  ;;  %v1421_v57 = vsel %vm1401_vm11, %v3735_v7, %v2629_v39  ;;  %vm1639_vm6 = vcmp.gt.f32.partialorder %v3775_v16, 0.0  ;;  %vm1636_vm9 = vcmp.gt.f32.partialorder %v3771_v27, 0.0  ;;  %vm1637_vm10 = vcmp.gt.f32.partialorder %v3782_v26, 0.0 }
 0x436   :  { %3072 = vpow2.f32 %v1650_v11  ;;  %v1761_v35 = vmin.f32 %v3787_v31, 0.0  ;;  %v1747_v18 = vmul.f32 %v3051_v17, %v2864_v5  ;;  %1432 = vrot.lane.b32.xlu0 %v1421_v57, %s3172_s22  ;;  %1430 = vrot.lane.b32.xlu1 %v1420_v60, %s3172_s22  ;;  %v3798_v13 = vadd.f32 %v3699_v45, %v1744_v36  ;;  %v1064_v39 = vpop.xlane.xlu0 %1063 }
 0x437   :  { %v3055_v44 = vpop.eup %3054  ;;  %v1732_v41 = vpop.f32.mrf.mxu0  ;;  %3074 = vrcp.f32 %v1055_v8  ;;  %v1646_v19 = vmul.f32 1.442695, %v1641_v28  ;;  %vm1757_vm7 = vcmp.gt.f32.partialorder %v3787_v31, 0.0 }
 0x438   :  { %v3057_v37 = vpop.eup %3056  ;;  %v1767_v7 = vmul.f32 1.442695, %v1761_v35  ;;  %v3801_v46 = vadd.f32 %v3699_v45, %v1747_v18  ;;  %v1745_v0 = vmul.f32 %v3053_v10, %v1732_v41  ;;  %3076 = vrcp.f32 %v1049_v4 }
 0x439   :  { %v3059_v14 = vpop.eup %3058  ;;  %v1759_v56 = vmin.f32 %v3798_v13, 0.0  ;;  %v2634_v23 = vadd.f32 -1.0, %v3055_v44  ;;  %v2626_v62 = vadd.f32 -1.0, %v3057_v37  ;;  %vm1755_vm11 = vcmp.gt.f32.partialorder %v3798_v13, 0.0 }
 0x43a   :  { %3078 = vpow2.f32 %v1767_v7  ;;  %v1762_v55 = vmin.f32 %v3801_v46, 0.0  ;;  %v3808_v63 = vadd.f32 %v3699_v45, %v1745_v0  ;;  %v1067_v45 = vpop.xlane.xlu1 %1066  ;;  %v2627_v47 = vadd.f32 -1.0, %v3059_v14  ;;  %v3828_v18 = vpop.permute.xlu0 %1986 }
 0x43b   :  { %v3061_v33 = vpop.eup %3060  ;;  %3080 = vpow2.f32 %v1644_v6  ;;  %v1763_v48 = vmul.f32 1.442695, %v1759_v56  ;;  %v1539_v42 = vsel %vm1519_vm13, %v3744_v9, %v2634_v23  ;;  %v1418_v17 = vsel %vm1398_vm15, %v3732_v40, %v2626_v62 }
 0x43c   :  { %v3063_v30 = vpop.eup %3062  ;;  %v1769_v4 = vmul.f32 1.442695, %v1762_v55  ;;  %v1760_v24 = vmin.f32 %v3808_v63, 0.0  ;;  %1549 = vrot.lane.b32.xlu1 %v1539_v42, %s3173_s2  ;;  %v2635_v29 = vadd.f32 -1.0, %v3061_v33  ;;  %3082 = vpow2.f32 %v1646_v19 }
 0x43d   :  { %v3065_v59 = vpop.eup %3064  ;;  %v2632_v61 = vadd.f32 -1.0, %v3063_v30  ;;  %v1419_v28 = vsel %vm1399_vm0, %v3739_v43, %v2627_v47  ;;  %vm1758_vm8 = vcmp.gt.f32.partialorder %v3801_v46, 0.0  ;;  %vm1756_vm12 = vcmp.gt.f32.partialorder %v3808_v63, 0.0 }
 0x43e   :  { %v3067_v1 = vpop.eup %3066  ;;  %3084 = vpow2.f32 %v1769_v4  ;;  %v1765_v9 = vmul.f32 1.442695, %v1760_v24  ;;  %v1540_v32 = vsel %vm1520_vm14, %v3753_v25, %v2635_v29  ;;  %v1868_v8 = vpop.permute.xlu1 %1867 }
 0x43f   :  { %v3069_v20 = vpop.eup %3068  ;;  %3086 = vpow2.f32 %v1763_v48  ;;  %1551 = vrot.lane.b32.xlu0 %v1540_v32, %s3173_s2  ;;  %v1537_v40 = vsel %vm1517_vm2, %v3748_v12, %v2632_v61 }
 0x440   :  { %v3071_v54 = vpop.eup %3070  ;;  %1426 = vrot.lane.b32.xlu1 %v1418_v17, %s3172_s22  ;;  %3088 = vpow2.f32 %v1765_v9  ;;  %v2633_v36 = vadd.f32 -1.0, %v3069_v20 }
 0x441   :  { %v2871_v11 = vpop.f32.mrf.mxu1  ;;  %v2640_v60 = vadd.f32 -1.0, %v3071_v54  ;;  %3090 = vrcp.f32 %v1064_v39 }
 0x442   :  { %v1865_v25 = vmul.f32 %v3067_v1, %v2871_v11  ;;  %3092 = vrcp.f32 %v1058_v34  ;;  %v1538_v0 = vsel %vm1518_vm4, %v3758_v53, %v2633_v36 }
 0x443   :  { %v3073_v5 = vpop.eup %3072  ;;  %v1848_v57 = vpop.f32.mrf.mxu1  ;;  %1428 = vrot.lane.b32.xlu0 %v1419_v28, %s3172_s22  ;;  %3094 = vrcp.f32 %v1067_v45  ;;  %v1658_v56 = vsel %vm1638_vm5, %v3764_v2, %v2640_v60 }
 0x444   :  { %v3825_v10 = vadd.f32 %v1868_v8, %v1865_v25  ;;  %v1863_v35 = vmul.f32 %v3065_v59, %v1848_v57  ;;  %1545 = vrot.lane.b32.xlu1 %v1537_v40, %s3173_s2  ;;  %v3075_v44 = vpop.eup %3074  ;;  %v2641_v43 = vadd.f32 -1.0, %v3073_v5  ;;  %3096 = vrcp.f32 %v3803_v22 }
 0x445   :  { %v2872_v6 = vpop.f32.mrf.mxu1  ;;  %v3077_v41 = vpop.eup %3076 }
 0x446   :  { %v1880_v12 = vmin.f32 %v3825_v10, 0.0  ;;  %v3833_v37 = vadd.f32 %v1868_v8, %v1863_v35  ;;  %v1866_v7 = vmul.f32 %v3075_v44, %v2872_v6  ;;  %v1659_v53 = vsel %vm1639_vm6, %v3775_v16, %v2641_v43 }
 0x447   :  { %v3079_v14 = vpop.eup %3078  ;;  %v1851_v19 = vpop.f32.mrf.mxu1  ;;  %1547 = vrot.lane.b32.xlu0 %v1538_v0, %s3173_s2  ;;  %vm1876_vm13 = vcmp.gt.f32.partialorder %v3825_v10, 0.0  ;;  %vm1198_vm6 = vcmask 64512  }
 0x448   :  { %v3081_v23 = vpop.eup %3080  ;;  %v1886_v55 = vmul.f32 1.442695, %v1880_v12  ;;  %v1878_v33 = vmin.f32 %v3833_v37, 0.0  ;;  %v3840_v48 = vadd.f32 %v1868_v8, %v1866_v7  ;;  %v1864_v42 = vmul.f32 %v3077_v41, %v1851_v19  ;;  %1668 = vrot.lane.b32.xlu1 %v1658_v56, %s3174_s23 }
 0x449   :  { %v2646_v62 = vadd.f32 -1.0, %v3079_v14  ;;  %v3083_v2 = vpop.eup %3082  ;;  %v2638_v22 = vadd.f32 -1.0, %v3081_v23  ;;  %vm1874_vm15 = vcmp.gt.f32.partialorder %v3833_v37, 0.0 }
 0x44a   :  { %3098 = vpow2.f32 %v1886_v55  ;;  %v1882_v30 = vmul.f32 1.442695, %v1878_v33  ;;  %v1881_v34 = vmin.f32 %v3840_v48, 0.0  ;;  %v3847_v4 = vadd.f32 %v1868_v8, %v1864_v42  ;;  %v977_v24 = vpop.xlane.xlu0 %976 }
 0x44b   :  { %v3085_v29 = vpop.eup %3084  ;;  %3100 = vrcp.f32 %v977_v24  ;;  %1670 = vrot.lane.b32.xlu0 %v1659_v53, %s3174_s23  ;;  %v1777_v59 = vsel %vm1757_vm7, %v3787_v31, %v2646_v62  ;;  %v2639_v17 = vadd.f32 -1.0, %v3083_v2  ;;  %v1656_v54 = vsel %vm1636_vm9, %v3771_v27, %v2638_v22  ;;  %v3162_v24 = vld [vmem:[%s4014_s5] ss:$0 sm:$0xff] }
 0x44c   :  { %v3087_v45 = vpop.eup %3086  ;;  %3102 = vpow2.f32 %v1882_v30  ;;  %v1888_v16 = vmul.f32 1.442695, %v1881_v34  ;;  %v1879_v1 = vmin.f32 %v3847_v4, 0.0  ;;  %1787 = vrot.lane.b32.xlu1 %v1777_v59, %s3175_s24  ;;  %v2647_v9 = vadd.f32 -1.0, %v3085_v29 }
 0x44d   :  { %v3089_v61 = vpop.eup %3088  ;;  %v2644_v39 = vadd.f32 -1.0, %v3087_v45  ;;  %vm1877_vm14 = vcmp.gt.f32.partialorder %v3840_v48, 0.0  ;;  %vm1875_vm0 = vcmp.gt.f32.partialorder %v3847_v4, 0.0 }
 0x44e   :  { %3104 = vpow2.f32 %v1888_v16  ;;  %v1884_v32 = vmul.f32 1.442695, %v1879_v1  ;;  %v974_v47 = vpop.xlane.xlu1 %973  ;;  %v980_v20 = vpop.xlane.xlu0 %979  ;;  %v1778_v31 = vsel %vm1758_vm8, %v3801_v46, %v2647_v9  ;;  %v1657_v46 = vsel %vm1637_vm10, %v3782_v26, %v2639_v17 }
 0x44f   :  { %3106 = vrcp.f32 %v974_v47  ;;  %1789 = vrot.lane.b32.xlu0 %v1778_v31, %s3175_s24  ;;  %v3091_v11 = vpop.eup %3090  ;;  %v2645_v5 = vadd.f32 -1.0, %v3089_v61  ;;  %v1775_v27 = vsel %vm1755_vm11, %v3798_v13, %v2644_v39  ;;  %vm2145_vm8 = vcmask 1043456  }
 0x450   :  { %3108 = vpow2.f32 %v1884_v32  ;;  %1664 = vrot.lane.b32.xlu1 %v1656_v54, %s3174_s23  ;;  %v3093_v25 = vpop.eup %3092 }
 0x451   :  { %3110 = vrcp.f32 %v980_v20  ;;  %v2879_v8 = vpop.f32.mrf.mxu0  ;;  %v3095_v40 = vpop.eup %3094  ;;  %v1776_v12 = vsel %vm1756_vm12, %v3808_v63, %v2645_v5  ;;  %v2936_v5 = vld [vmem:[%s4016_s6 + $0x8] sm:$0xff]  }
 0x452   :  { %v1984_v28 = vmul.f32 %v3091_v11, %v2879_v8  ;;  %v983_v36 = vpop.xlane.xlu0 %982  ;;  %v3097_v26 = vpop.eup %3096 }
 0x453   :  { %3112 = vrcp.f32 %v983_v36  ;;  %v1967_v57 = vpop.f32.mrf.mxu0  ;;  %1666 = vrot.lane.b32.xlu0 %v1657_v46, %s3174_s23 }
 0x454   :  { %v3865_v60 = vadd.f32 %v3828_v18, %v1984_v28  ;;  %v1982_v35 = vmul.f32 %v3093_v25, %v1967_v57  ;;  %1783 = vrot.lane.b32.xlu1 %v1775_v27, %s3175_s24  ;;  %v2935_v28 = vld [vmem:[%s4016_s6 + $0x10] sm:$0xff]  }
 0x455   :  { %v2880_v44 = vpop.f32.mrf.mxu0 }
 0x456   :  { %v1999_v6 = vmin.f32 %v3865_v60, 0.0  ;;  %v3871_v43 = vadd.f32 %v3828_v18, %v1982_v35  ;;  %v1985_v41 = vmul.f32 %v3095_v40, %v2880_v44  ;;  %v2937_v40 = vld [vmem:[%s4016_s6] sm:$0xff]   ;;  %vm1995_vm5 = vcmp.gt.f32.partialorder %v3865_v60, 0.0 }
 0x457   :  { %v3099_v13 = vpop.eup %3098  ;;  %v1970_v7 = vpop.f32.mrf.mxu0  ;;  %1785 = vrot.lane.b32.xlu0 %v1776_v12, %s3175_s24 }
 0x458   :  { %v3101_v0 = vpop.eup %3100  ;;  %v2005_v14 = vmul.f32 1.442695, %v1999_v6  ;;  %v1997_v19 = vmin.f32 %v3871_v43, 0.0  ;;  %v3877_v56 = vadd.f32 %v3828_v18, %v1985_v41  ;;  %v1983_v23 = vmul.f32 %v3097_v26, %v1970_v7 }
 0x459   :  { %v3103_v55 = vpop.eup %3102  ;;  %v2652_v33 = vadd.f32 -1.0, %v3099_v13  ;;  %v1161_v42 = vmul.f32 %v3101_v0, %v3718_v49  ;;  %vm1993_vm2 = vcmp.gt.f32.partialorder %v3871_v43, 0.0 }
 0x45a   :  { %v2001_v53 = vmul.f32 1.442695, %v1997_v19  ;;  %v2000_v62 = vmin.f32 %v3877_v56, 0.0  ;;  %v3882_v63 = vadd.f32 %v3828_v18, %v1983_v23  ;;  %3114 = vpow2.f32 %v2005_v14 }
 0x45b   :  { %v3105_v2 = vpop.eup %3104  ;;  %v1896_v30 = vsel %vm1876_vm13, %v3825_v10, %v2652_v33  ;;  %v2650_v34 = vadd.f32 -1.0, %v3103_v55  ;;  %v3889_v29 = vadd.f32 %v3162_v24, %v1161_v42  ;;  %vm1996_vm9 = vcmp.gt.f32.partialorder %v3877_v56, 0.0  ;;  %v2131_v55 = vld [vmem:[%s4017_s8] sm:$0xf] }
 0x45c   :  { %v3107_v49 = vpop.eup %3106  ;;  %3116 = vpow2.f32 %v2001_v53  ;;  %v2007_v59 = vmul.f32 1.442695, %v2000_v62  ;;  %v1998_v22 = vmin.f32 %v3882_v63, 0.0  ;;  %1906 = vrot.lane.b32.xlu1 %v1896_v30, %s3176_s27  ;;  %v2653_v18 = vadd.f32 -1.0, %v3105_v2  ;;  %2893 = vmatprep.subr.msk.mxu0 %vm2145_vm8, %v2131_v55 }
 0x45d   :  { %v3109_v45 = vpop.eup %3108  ;;  %v1160_v10 = vmul.f32 %v3107_v49, %v3709_v52  ;;  %v1894_v32 = vsel %vm1874_vm15, %v3833_v37, %v2650_v34  ;;  %v1179_v17 = vmin.f32 %v3889_v29, 0.0  ;;  %vm1994_vm4 = vcmp.gt.f32.partialorder %v3882_v63, 0.0  ;;  %2894 = vmatpush3.msk.msra.mxu0 %vm2145_vm8, %v2131_v55 }
 0x45e   :  { %v3111_v16 = vpop.eup %3110  ;;  %v2003_v1 = vmul.f32 1.442695, %v1998_v22  ;;  %v1897_v9 = vsel %vm1877_vm14, %v3840_v48, %v2653_v18  ;;  %v2651_v47 = vadd.f32 -1.0, %v3109_v45  ;;  %3118 = vpow2.f32 %v2007_v59 }
 0x45f   :  { %1908 = vrot.lane.b32.xlu0 %v1897_v9, %s3176_s27  ;;  %v1162_v20 = vmul.f32 %v3111_v16, %v3707_v3  ;;  %v3898_v31 = vadd.f32 %v3162_v24, %v1160_v10  ;;  %v1184_v54 = vmul.f32 1.442695, %v1179_v17  ;;  %v2934_v3 = vld [vmem:[%s4016_s6 + $0x18] sm:$0xff]   ;;  %vm1175_vm7 = vcmp.gt.f32.partialorder %v3889_v29, 0.0 }
 0x460   :  { %v3113_v61 = vpop.eup %3112  ;;  %3120 = vpow2.f32 %v2003_v1  ;;  %1902 = vrot.lane.b32.xlu1 %v1894_v32, %s3176_s27  ;;  %v1895_v37 = vsel %vm1875_vm0, %v3847_v4, %v2651_v47  ;;  %2881 = vmatprep.subr.bf16.mxu1 %v2934_v3  ;;  %vm1319_vm13 = vcmask 130112   ;;  %vm1438_vm14 = vcmask 195712  }
 0x461   :  { %v3902_v52 = vadd.f32 %v3162_v24, %v1162_v20  ;;  %v1178_v48 = vmin.f32 %v3898_v31, 0.0  ;;  %v1163_v39 = vmul.f32 %v3113_v61, %v3711_v15  ;;  %3122 = vpow2.f32 %v1184_v54  ;;  %2882 = vmatpush3.bf16.msra.mxu1 %v2934_v3 }
 0x462   :  { %2883 = vmatprep.subr.bf16.mxu1 %v2935_v28  ;;  %vm1174_vm10 = vcmp.gt.f32.partialorder %v3898_v31, 0.0  ;;  %vm1557_vm15 = vcmask 261312   ;;  %vm1676_vm0 = vcmask 326912  }
 0x463   :  { %1904 = vrot.lane.b32.xlu0 %v1895_v37, %s3176_s27  ;;  %v1180_v11 = vmin.f32 %v3902_v52, 0.0  ;;  %v1182_v8 = vmul.f32 1.442695, %v1178_v48  ;;  %v3911_v25 = vadd.f32 %v3162_v24, %v1163_v39  ;;  %vm1176_vm11 = vcmp.gt.f32.partialorder %v3902_v52, 0.0 }
 0x465   :  { %v1186_v36 = vmul.f32 1.442695, %v1180_v11  ;;  %3124 = vpow2.f32 %v1182_v8  ;;  %v1181_v15 = vmin.f32 %v3911_v25, 0.0  ;;  %2884 = vmatpush3.bf16.msra.mxu1 %v2935_v28  ;;  %vm1177_vm12 = vcmp.gt.f32.partialorder %v3911_v25, 0.0 }
 0x466   :  { %2885 = vmatprep.subr.bf16.mxu1 %v2936_v5 }
 0x467   :  { %3126 = vpow2.f32 %v1186_v36  ;;  %v3115_v4 = vpop.eup %3114  ;;  %v1188_v46 = vmul.f32 1.442695, %v1181_v15 }
 0x468   :  { %v2658_v26 = vadd.f32 -1.0, %v3115_v4 }
 0x469   :  { %v3117_v57 = vpop.eup %3116  ;;  %3128 = vpow2.f32 %v1188_v46  ;;  %2886 = vmatpush3.bf16.msra.mxu1 %v2936_v5 }
 0x46a   :  { %v2656_v27 = vadd.f32 -1.0, %v3117_v57  ;;  %2887 = vmatprep.subr.bf16.mxu1 %v2937_v40  ;;  %v2015_v7 = vsel %vm1995_vm5, %v3865_v60, %v2658_v26  ;;  %vm2033_vm5 = vcmask 523712   ;;  %v2234_v57 = vld [vmem:[%s4018_s7] sm:$0xf] }
 0x46b   :  { %v3119_v35 = vpop.eup %3118  ;;  %2901 = vmatprep.subr.msk.mxu0 %vm2145_vm8, %v2234_v57 }
 0x46c   :  { %v2013_v44 = vsel %vm1993_vm2, %v3871_v43, %v2656_v27  ;;  %v2659_v0 = vadd.f32 -1.0, %v3119_v35  ;;  %vm1795_vm2 = vcmask 392512  }
 0x46d   :  { %v3121_v6 = vpop.eup %3120  ;;  %2021 = vrot.lane.b32.xlu1 %v2013_v44, %s3177_s12  ;;  %2888 = vmatpush3.bf16.msra.mxu1 %v2937_v40 }
 0x46e   :  { %v2657_v41 = vadd.f32 -1.0, %v3121_v6  ;;  %v3123_v12 = vpop.eup %3122  ;;  %v2016_v33 = vsel %vm1996_vm9, %v3877_v56, %v2659_v0 }
 0x46f   :  { %v2615_v43 = vadd.f32 -1.0, %v3123_v12 }
 0x470   :  { %v2014_v13 = vsel %vm1994_vm4, %v3882_v63, %v2657_v41  ;;  %vm1914_vm4 = vcmask 458112  }
 0x471   :  { %2023 = vrot.lane.b32.xlu0 %v2014_v13, %s3177_s12  ;;  %2025 = vrot.lane.b32.xlu1 %v2015_v7, %s3177_s12  ;;  %v1195_v23 = vsel %vm1175_vm7, %v3889_v29, %v2615_v43 }
 0x472   :  { %v3125_v14 = vpop.eup %3124  ;;  %1200 = vst.msk [vmem:[#allocation2 + $0x8] sm:$0xff] %vm1198_vm6, %v1195_v23 }
 0x473   :  { %v2614_v19 = vadd.f32 -1.0, %v3125_v14 }
 0x474   :  { %v3127_v60 = vpop.eup %3126 }
 0x475   :  { %2027 = vrot.lane.b32.xlu0 %v2016_v33, %s3177_s12  ;;  %v2616_v42 = vadd.f32 -1.0, %v3127_v60  ;;  %v1194_v53 = vsel %vm1174_vm10, %v3898_v31, %v2614_v19 }
 0x476   :  { %1199 = vst.msk [vmem:[#allocation2] sm:$0xff] %vm1198_vm6, %v1194_v53  ;;  %v3129_v62 = vpop.eup %3128 }
 0x477   :  { %v1196_v63 = vsel %vm1176_vm11, %v3902_v52, %v2616_v42  ;;  %v2617_v56 = vadd.f32 -1.0, %v3129_v62 }
 0x478   :  { %1201 = vst.msk [vmem:[#allocation2 + $0x10] sm:$0xff] %vm1198_vm6, %v1196_v63 }
 0x479   :  { %v1197_v2 = vsel %vm1177_vm12, %v3911_v25, %v2617_v56 }
 0x47a   :  { %1202 = vst.msk [vmem:[#allocation2 + $0x18] sm:$0xff] %vm1198_vm6, %v1197_v2  ;;  %vm2132_vm6 = vcmask 31744  }
 0x49c   :  { %v1312_v30 = vpop.permute.xlu1 %1311 }
 0x49d   :  { %1322 = vst.msk [vmem:[#allocation2 + $0x10] sm:$0xff] %vm1319_vm13, %v1312_v30 }
 0x4a0   :  { %v1308_v34 = vpop.permute.xlu1 %1307 }
 0x4a1   :  { %1320 = vst.msk [vmem:[#allocation2] sm:$0xff] %vm1319_vm13, %v1308_v34 }
 0x4a2   :  { %v1310_v24 = vpop.permute.xlu0 %1309 }
 0x4a3   :  { %1321 = vst.msk [vmem:[#allocation2 + $0x8] sm:$0xff] %vm1319_vm13, %v1310_v24 }
 0x4a4   :  { %v1314_v29 = vpop.permute.xlu1 %1313 }
 0x4a5   :  { %1323 = vst.msk [vmem:[#allocation2 + $0x18] sm:$0xff] %vm1319_vm13, %v1314_v29 }
 0x4a8   :  { %v1431_v49 = vpop.permute.xlu1 %1430  ;;  %v1433_v59 = vpop.permute.xlu0 %1432 }
 0x4a9   :  { %1441 = vst.msk [vmem:[#allocation2 + $0x10] sm:$0xff] %vm1438_vm14, %v1431_v49  ;;  %1442 = vst.msk [vmem:[#allocation2 + $0x18] sm:$0xff] %vm1438_vm14, %v1433_v59 }
 0x4ae   :  { %v1550_v22 = vpop.permute.xlu1 %1549 }
 0x4af   :  { %1560 = vst.msk [vmem:[#allocation2 + $0x10] sm:$0xff] %vm1557_vm15, %v1550_v22 }
 0x4b1   :  { %v1552_v18 = vpop.permute.xlu0 %1551 }
 0x4b2   :  { %v1427_v45 = vpop.permute.xlu1 %1426  ;;  %1561 = vst.msk [vmem:[#allocation2 + $0x18] sm:$0xff] %vm1557_vm15, %v1552_v18 }
 0x4b3   :  { %1439 = vst.msk [vmem:[#allocation2] sm:$0xff] %vm1438_vm14, %v1427_v45 }
 0x4b5   :  { %v1429_v10 = vpop.permute.xlu0 %1428 }
 0x4b6   :  { %v1546_v16 = vpop.permute.xlu1 %1545  ;;  %1440 = vst.msk [vmem:[#allocation2 + $0x8] sm:$0xff] %vm1438_vm14, %v1429_v10 }
 0x4b7   :  { %1558 = vst.msk [vmem:[#allocation2] sm:$0xff] %vm1557_vm15, %v1546_v16 }
 0x4b9   :  { %v1548_v1 = vpop.permute.xlu0 %1547 }
 0x4ba   :  { %v1669_v9 = vpop.permute.xlu1 %1668  ;;  %1559 = vst.msk [vmem:[#allocation2 + $0x8] sm:$0xff] %vm1557_vm15, %v1548_v1 }
 0x4bb   :  { %1679 = vst.msk [vmem:[#allocation2 + $0x10] sm:$0xff] %vm1676_vm0, %v1669_v9 }
 0x4bd   :  { %v1671_v32 = vpop.permute.xlu0 %1670 }
 0x4be   :  { %v1788_v47 = vpop.permute.xlu1 %1787  ;;  %1680 = vst.msk [vmem:[#allocation2 + $0x18] sm:$0xff] %vm1676_vm0, %v1671_v32 }
 0x4bf   :  { %1798 = vst.msk [vmem:[#allocation2 + $0x10] sm:$0xff] %vm1795_vm2, %v1788_v47 }
 0x4c1   :  { %v1790_v20 = vpop.permute.xlu0 %1789 }
 0x4c2   :  { %v1665_v31 = vpop.permute.xlu1 %1664  ;;  %1799 = vst.msk [vmem:[#allocation2 + $0x18] sm:$0xff] %vm1795_vm2, %v1790_v20 }
 0x4c3   :  { %1677 = vst.msk [vmem:[#allocation2] sm:$0xff] %vm1676_vm0, %v1665_v31 }
 0x4c5   :  { %v1667_v17 = vpop.permute.xlu0 %1666 }
 0x4c6   :  { %v1784_v61 = vpop.permute.xlu1 %1783  ;;  %1678 = vst.msk [vmem:[#allocation2 + $0x8] sm:$0xff] %vm1676_vm0, %v1667_v17 }
 0x4c7   :  { %1796 = vst.msk [vmem:[#allocation2] sm:$0xff] %vm1795_vm2, %v1784_v61 }
 0x4c9   :  { %v1786_v52 = vpop.permute.xlu0 %1785 }
 0x4ca   :  { %1797 = vst.msk [vmem:[#allocation2 + $0x8] sm:$0xff] %vm1795_vm2, %v1786_v52 }
 0x4ce   :  { %v1907_v48 = vpop.permute.xlu1 %1906 }
 0x4cf   :  { %1917 = vst.msk [vmem:[#allocation2 + $0x10] sm:$0xff] %vm1914_vm4, %v1907_v48 }
 0x4d1   :  { %v1909_v54 = vpop.permute.xlu0 %1908 }
 0x4d2   :  { %v1903_v37 = vpop.permute.xlu1 %1902  ;;  %1918 = vst.msk [vmem:[#allocation2 + $0x18] sm:$0xff] %vm1914_vm4, %v1909_v54 }
 0x4d3   :  { %1915 = vst.msk [vmem:[#allocation2] sm:$0xff] %vm1914_vm4, %v1903_v37 }
 0x4d5   :  { %v1905_v39 = vpop.permute.xlu0 %1904 }
 0x4d6   :  { %1916 = vst.msk [vmem:[#allocation2 + $0x8] sm:$0xff] %vm1914_vm4, %v1905_v39 }
 0x4df   :  { %v2022_v3 = vpop.permute.xlu1 %2021 }
 0x4e0   :  { %2034 = vst.msk [vmem:[#allocation2] sm:$0xff] %vm2033_vm5, %v2022_v3 }
 0x4e3   :  { %v2026_v11 = vpop.permute.xlu1 %2025  ;;  %v2024_v8 = vpop.permute.xlu0 %2023 }
 0x4e4   :  { %2036 = vst.msk [vmem:[#allocation2 + $0x10] sm:$0xff] %vm2033_vm5, %v2026_v11  ;;  %2035 = vst.msk [vmem:[#allocation2 + $0x8] sm:$0xff] %vm2033_vm5, %v2024_v8 }
 0x4e7   :  { %v2028_v25 = vpop.permute.xlu0 %2027  ;;  %v2038_v28 = vld [vmem:[#allocation2] sm:$0xff] }
 0x4e8   :  { %2037 = vst.msk [vmem:[#allocation2 + $0x18] sm:$0xff] %vm2033_vm5, %v2028_v25 }
 0x4eb   :  { %v2039_v36 = vld [vmem:[#allocation2 + $0x8] sm:$0xff]  ;;  %v2040_v4 = vld [vmem:[#allocation2 + $0x10] sm:$0xff] }
 0x4ec   :  { %v2042_v15 = vpack.c.bf16 %v2039_v36, %v2038_v28 }
 0x4ee   :  { %2889 = vmatprep.mubr.msk.bf16.mxu1 %vm118_vm1, %v2042_v15 }
 0x4ef   :  { %v2041_v46 = vld [vmem:[#allocation2 + $0x18] sm:$0xff] }
 0x4f0   :  { %v2043_v5 = vpack.c.bf16 %v2041_v46, %v2040_v4 }
 0x4f2   :  { %2890 = vmatmul.mubr.msk.bf16.vlgmr.msra.gmra.mxu1 %vm118_vm1, %v2043_v5 }
 0x5b2   :  { %v2891_v27 = vpop.f32.mrf.mxu1 }
 0x5b4   :  { %v2116_v40 = vpop.f32.mrf.mxu1 }
 0x5b5   :  { %2895 = vmatprep.mubr.msk.f32.mxu0 %vm2132_vm6, %v2116_v40 }
 0x5b6   :  { %v2892_v35 = vpop.f32.mrf.mxu1 }
 0x5b7   :  { %v2473_v44 = vpack.c.bf16 %v2892_v35, %v2891_v27 }
 0x5b8   :  { %v2119_v26 = vpop.f32.mrf.mxu1 }
 0x5b9   :  { %v2472_v6 = vpack.c.bf16 %v2119_v26, %v2116_v40  ;;  %2896 = vmatmul.mubr.msk.f32.vlgmr.msra.gmra.mxu0 %vm2132_vm6, %v2119_v26  ;;  %2909 = vmatprep.subr.bf16.mxu1 %v2473_v44 }
 0x5ba   :  { %2898 = vmatprep.mubr.msk.f32.mxu0 %vm2132_vm6, %v2891_v27  ;;  %2910 = vmatpush3.bf16.msra.mxu1 %v2473_v44 }
 0x5bb   :  { %2911 = vmatprep.subr.bf16.mxu1 %v2472_v6  ;;  %2902 = vmatpush3.msk.msra.mxu0 %vm2145_vm8, %v2234_v57 }
 0x5bd   :  { %2899 = vmatmul.mubr.msk.f32.gmra.mxu0 %vm2132_vm6, %v2892_v35 }
 0x5be   :  { %2903 = vmatprep.mubr.msk.f32.mxu0 %vm2132_vm6, %v2116_v40  ;;  %2912 = vmatpush3.bf16.msra.mxu1 %v2472_v6 }
 0x5c1   :  { %2904 = vmatmul.mubr.msk.f32.vlgmr.msra.gmra.mxu0 %vm2132_vm6, %v2119_v26 }
 0x5c2   :  { %2906 = vmatprep.mubr.msk.f32.mxu0 %vm2132_vm6, %v2891_v27 }
 0x5c5   :  { %2907 = vmatmul.mubr.msk.f32.gmra.mxu0 %vm2132_vm6, %v2892_v35 }
 0x679   :  { %v2897_v41 = vpop.f32.mrf.mxu0 }
 0x67b   :  { %v2215_v12 = vpop.f32.mrf.mxu0 }
 0x67c   :  { %2323 = vxpose.xlu1.b32.start [1/4] (short) (narrow) %v2215_v12, 8 }
 0x67d   :  { %v2900_v13 = vpop.f32.mrf.mxu0 }
 0x67f   :  { %v2225_v7 = vpop.f32.mrf.mxu0 }
 0x680   :  { %2324 = vxpose.xlu1.b32.cont [2/4] (short) (narrow) %v2897_v41, 8 }
 0x681   :  { %v2905_v14 = vpop.f32.mrf.mxu0 }
 0x683   :  { %v2304_v19 = vpop.f32.mrf.mxu0 }
 0x684   :  { %2325 = vxpose.xlu1.b32.cont [3/4] (short) (narrow) %v2225_v7, 8 }
 0x685   :  { %v2908_v23 = vpop.f32.mrf.mxu0 }
 0x687   :  { %v2314_v55 = vpop.f32.mrf.mxu0 }
 0x688   :  { %2326 = vxpose.xlu1.b32.end [4/4] (short) (narrow) %v2900_v13, 8 }
 0x6f8   :  { %v2339_v0 = vpop.trf.xlu1 }
 0x6f9   :  { %v2358_v43 = vrot.slane %v2339_v0, %v3345_v50  ;;  %v2678_v0 = vld [vmem:[%s4019_s9] ss:$0 sm:$0xff] }
 0x6fb   :  { %2360 = vbcast.lane.b32.xlu0 %v2358_v43, 256 }
 0x6ff   :  { %2364 = vbcast.lane.b32.xlu0 %v2358_v43, 264 }
 0x703   :  { %2368 = vbcast.lane.b32.xlu0 %v2358_v43, 272 }
 0x707   :  { %2372 = vbcast.lane.b32.xlu0 %v2358_v43, 280 }
 0x725   :  { %2374 = vxpose.xlu0.b32.start [1/4] (short) (narrow) %v2304_v19, 8 }
 0x729   :  { %2375 = vxpose.xlu0.b32.cont [2/4] (short) (narrow) %v2905_v14, 8 }
 0x72d   :  { %2376 = vxpose.xlu0.b32.cont [3/4] (short) (narrow) %v2314_v55, 8 }
 0x731   :  { %2377 = vxpose.xlu0.b32.end [4/4] (short) (narrow) %v2908_v23, 8 }
 0x76d   :  { %v2361_v60 = vpop.permute.xlu0 %2360 }
 0x771   :  { %v2365_v33 = vpop.permute.xlu0 %2364 }
 0x775   :  { %v2369_v42 = vpop.permute.xlu0 %2368 }
 0x779   :  { %v2373_v53 = vpop.permute.xlu0 %2372 }
 0x7a1   :  { %v2390_v62 = vpop.trf.xlu0 }
 0x7a2   :  { %v2409_v63 = vrot.slane %v2390_v62, %v3345_v50 }
 0x7a4   :  { %v2411_v56 = vadd.f32 %v2409_v63, %v2365_v33  ;;  %v2410_v2 = vadd.f32 %v2409_v63, %v2361_v60  ;;  %v2412_v30 = vadd.f32 %v2409_v63, %v2369_v42  ;;  %v2413_v34 = vadd.f32 %v2409_v63, %v2373_v53 }
 0x7a6   :  { %vm2415_vm1 = vcmp.gt.f32.partialorder %v2411_v56, 0.0  ;;  %v2419_v24 = vmul.f32 0.2, %v2411_v56  ;;  %vm2414_vm7 = vcmp.gt.f32.partialorder %v2410_v2, 0.0  ;;  %v2418_v29 = vmul.f32 0.2, %v2410_v2 }
 0x7a7   :  { %vm2416_vm8 = vcmp.gt.f32.partialorder %v2412_v30, 0.0  ;;  %v2420_v49 = vmul.f32 0.2, %v2412_v30  ;;  %v2421_v50 = vmul.f32 0.2, %v2413_v34  ;;  %vm2417_vm9 = vcmp.gt.f32.partialorder %v2413_v34, 0.0 }
 0x7a8   :  { %v2423_v59 = vsel %vm2415_vm1, %v2411_v56, %v2419_v24  ;;  %v2422_v22 = vsel %vm2414_vm7, %v2410_v2, %v2418_v29 }
 0x7a9   :  { %v2429_v18 = vsel %vm743_vm3, %v2423_v59, -inf  ;;  %v2426_v45 = vsel %vm743_vm3, %v2422_v22, -inf  ;;  %v2424_v10 = vsel %vm2416_vm8, %v2412_v30, %v2420_v49  ;;  %v2425_v1 = vsel %vm2417_vm9, %v2413_v34, %v2421_v50 }
 0x7aa   :  { %2430 = vmax.xlane.f32.xlu0 %v2429_v18  ;;  %2427 = vmax.xlane.f32.xlu1 %v2426_v45  ;;  %v2432_v16 = vsel %vm743_vm3, %v2424_v10, -inf  ;;  %v2435_v9 = vsel %vm743_vm3, %v2425_v1, -inf }
 0x7ae   :  { %2433 = vmax.xlane.f32.xlu1 %v2432_v16 }
 0x7b2   :  { %2436 = vmax.xlane.f32.xlu1 %v2435_v9 }
 0x833   :  { %v2431_v32 = vpop.xlane.xlu0 %2430  ;;  %v2428_v47 = vpop.xlane.xlu1 %2427 }
 0x834   :  { %v2439_v20 = vsub.f32 %v2423_v59, %v2431_v32  ;;  %v2438_v31 = vsub.f32 %v2422_v22, %v2428_v47 }
 0x836   :  { %v2444_v17 = vmul.f32 1.442695, %v2439_v20  ;;  %v2442_v61 = vmul.f32 1.442695, %v2438_v31 }
 0x837   :  { %v2434_v52 = vpop.xlane.xlu1 %2433 }
 0x838   :  { %3130 = vpow2.f32 %v2444_v17  ;;  %v2440_v48 = vsub.f32 %v2424_v10, %v2434_v52 }
 0x839   :  { %3132 = vpow2.f32 %v2442_v61 }
 0x83a   :  { %v2446_v54 = vmul.f32 1.442695, %v2440_v48 }
 0x83b   :  { %v2437_v37 = vpop.xlane.xlu1 %2436 }
 0x83c   :  { %3134 = vpow2.f32 %v2446_v54  ;;  %v2441_v39 = vsub.f32 %v2425_v1, %v2437_v37 }
 0x83e   :  { %v2448_v3 = vmul.f32 1.442695, %v2441_v39 }
 0x840   :  { %3136 = vpow2.f32 %v2448_v3 }
 0x845   :  { %v3131_v11 = vpop.eup %3130 }
 0x846   :  { %v3133_v8 = vpop.eup %3132  ;;  %v2451_v25 = vmul.f32 %v3131_v11, %v3546_v58 }
 0x847   :  { %v2450_v28 = vmul.f32 %v3133_v8, %v3544_v51 }
 0x848   :  { %v2457_v36 = vsel %vm743_vm3, %v2451_v25, 0.0 }
 0x849   :  { %v3135_v15 = vpop.eup %3134  ;;  %2458 = vadd.xlane.f32.xlu0 %v2457_v36  ;;  %v2454_v4 = vsel %vm743_vm3, %v2450_v28, 0.0  ;;  %v2470_v46 = vpack.c.bf16 %v2451_v25, %v2450_v28 }
 0x84a   :  { %2455 = vadd.xlane.f32.xlu1 %v2454_v4  ;;  %v2452_v5 = vmul.f32 %v3135_v15, %v3566_v38 }
 0x84b   :  { %2913 = vmatprep.mubr.msk.bf16.mxu1 %vm743_vm3, %v2470_v46 }
 0x84c   :  { %v2460_v57 = vsel %vm743_vm3, %v2452_v5, 0.0 }
 0x84d   :  { %v3137_v27 = vpop.eup %3136 }
 0x84e   :  { %2461 = vadd.xlane.f32.xlu1 %v2460_v57  ;;  %v2453_v58 = vmul.f32 %v3137_v27, %v3563_v21 }
 0x850   :  { %v2463_v51 = vsel %vm743_vm3, %v2453_v58, 0.0  ;;  %v2471_v40 = vpack.c.bf16 %v2453_v58, %v2452_v5 }
 0x851   :  { %2464 = vadd.xlane.f32.xlu0 %v2463_v51 }
 0x852   :  { %2914 = vmatmul.mubr.msk.bf16.vlgmr.msra.gmra.mxu1 %vm743_vm3, %v2471_v40 }
 0x8d2   :  { %v2459_v44 = vpop.xlane.xlu0 %2458 }
 0x8d3   :  { %v2456_v35 = vpop.xlane.xlu1 %2455 }
 0x8d4   :  { %3138 = vrcp.f32 %v2456_v35 }
 0x8d7   :  { %v2462_v26 = vpop.xlane.xlu1 %2461 }
 0x8d8   :  { %3140 = vrcp.f32 %v2462_v26 }
 0x8d9   :  { %3142 = vrcp.f32 %v2459_v44 }
 0x8da   :  { %v2465_v38 = vpop.xlane.xlu0 %2464 }
 0x8db   :  { %3144 = vrcp.f32 %v2465_v38 }
 0x8e1   :  { %v3139_v41 = vpop.eup %3138 }
 0x8e5   :  { %v3141_v12 = vpop.eup %3140 }
 0x8e6   :  { %v3143_v14 = vpop.eup %3142 }
 0x8e8   :  { %v3145_v23 = vpop.eup %3144 }
 0x912   :  { %v2915_v6 = vpop.f32.mrf.mxu1 }
 0x913   :  { %v2531_v7 = vmul.f32 %v3141_v12, %v2915_v6 }
 0x914   :  { %v2514_v13 = vpop.f32.mrf.mxu1 }
 0x915   :  { %v2529_v21 = vmul.f32 %v3139_v41, %v2514_v13  ;;  %v2542_v60 = vadd.f32 %v2678_v0, %v2531_v7 }
 0x916   :  { %v2916_v43 = vpop.f32.mrf.mxu1 }
 0x917   :  { %v2540_v19 = vadd.f32 %v2678_v0, %v2529_v21  ;;  %v2532_v33 = vmul.f32 %v3145_v23, %v2916_v43  ;;  %v2550_v2 = vsel %vm2132_vm6, %v2542_v60, -inf }
 0x918   :  { %v2517_v55 = vpop.f32.mrf.mxu1 }
 0x919   :  { %v2530_v42 = vmul.f32 %v3143_v14, %v2517_v55  ;;  %v2544_v53 = vsel %vm2132_vm6, %v2540_v19, -inf  ;;  %v2543_v63 = vadd.f32 %v2678_v0, %v2532_v33 }
 0x91a   :  { %2545 = vmax.xlane.f32.xlu1 %v2544_v53 }
 0x91b   :  { %v2541_v62 = vadd.f32 %v2678_v0, %v2530_v42  ;;  %v2553_v30 = vsel %vm2132_vm6, %v2543_v63, -inf }
 0x91d   :  { %v2547_v56 = vsel %vm2132_vm6, %v2541_v62, -inf }
 0x91e   :  { %2548 = vmax.xlane.f32.xlu0 %v2547_v56  ;;  %2551 = vmax.xlane.f32.xlu1 %v2550_v2 }
 0x922   :  { %2554 = vmax.xlane.f32.xlu0 %v2553_v30 }
 0x9a3   :  { %v2546_v34 = vpop.xlane.xlu1 %2545 }
 0x9a4   :  { %v2556_v24 = vsub.f32 %v2540_v19, %v2546_v34 }
 0x9a6   :  { %v2560_v29 = vmul.f32 1.442695, %v2556_v24 }
 0x9a7   :  { %v2549_v49 = vpop.xlane.xlu0 %2548  ;;  %v2552_v59 = vpop.xlane.xlu1 %2551 }
 0x9a8   :  { %3146 = vpow2.f32 %v2560_v29  ;;  %v2557_v22 = vsub.f32 %v2541_v62, %v2549_v49  ;;  %v2558_v18 = vsub.f32 %v2542_v60, %v2552_v59 }
 0x9aa   :  { %v2562_v45 = vmul.f32 1.442695, %v2557_v22  ;;  %v2564_v10 = vmul.f32 1.442695, %v2558_v18 }
 0x9ab   :  { %v2555_v50 = vpop.xlane.xlu0 %2554 }
 0x9ac   :  { %3148 = vpow2.f32 %v2562_v45  ;;  %v2559_v16 = vsub.f32 %v2543_v63, %v2555_v50 }
 0x9ad   :  { %3150 = vpow2.f32 %v2564_v10 }
 0x9ae   :  { %v2566_v1 = vmul.f32 1.442695, %v2559_v16 }
 0x9b0   :  { %3152 = vpow2.f32 %v2566_v1 }
 0x9b5   :  { %v3147_v9 = vpop.eup %3146 }
 0x9b6   :  { %v2568_v32 = vsel %vm2132_vm6, %v3147_v9, 0.0 }
 0x9b7   :  { %2569 = vadd.xlane.f32.xlu1 %v2568_v32 }
 0x9b9   :  { %v3149_v47 = vpop.eup %3148 }
 0x9ba   :  { %v3151_v20 = vpop.eup %3150  ;;  %v2571_v31 = vsel %vm2132_vm6, %v3149_v47, 0.0 }
 0x9bb   :  { %2572 = vadd.xlane.f32.xlu0 %v2571_v31  ;;  %v2574_v17 = vsel %vm2132_vm6, %v3151_v20, 0.0 }
 0x9bc   :  { %2575 = vadd.xlane.f32.xlu1 %v2574_v17 }
 0x9bd   :  { %v3153_v61 = vpop.eup %3152 }
 0x9be   :  { %v2577_v52 = vsel %vm2132_vm6, %v3153_v61, 0.0 }
 0x9bf   :  { %2578 = vadd.xlane.f32.xlu0 %v2577_v52 }
 0xa40   :  { %v2570_v48 = vpop.xlane.xlu1 %2569 }
 0xa41   :  { %3154 = vlog2.f32 %v2570_v48 }
 0xa44   :  { %v2573_v54 = vpop.xlane.xlu0 %2572 }
 0xa45   :  { %3156 = vlog2.f32 %v2573_v54  ;;  %v2576_v37 = vpop.xlane.xlu1 %2575 }
 0xa46   :  { %3158 = vlog2.f32 %v2576_v37 }
 0xa48   :  { %v2579_v39 = vpop.xlane.xlu0 %2578 }
 0xa49   :  { %3160 = vlog2.f32 %v2579_v39 }
 0xa4e   :  { %v3155_v3 = vpop.eup %3154 }
 0xa4f   :  { %v2581_v11 = vmul.f32 0.6931472, %v3155_v3 }
 0xa51   :  { %v2588_v8 = vsub.f32 %v2556_v24, %v2581_v11 }
 0xa52   :  { %v3157_v25 = vpop.eup %3156 }
 0xa53   :  { %v3159_v28 = vpop.eup %3158  ;;  %2592 = vst.msk [vmem:[%s4020_s10] sm:$0xff] %vm2132_vm6, %v2588_v8  ;;  %v2583_v36 = vmul.f32 0.6931472, %v3157_v25 }
 0xa54   :  { %v2585_v15 = vmul.f32 0.6931472, %v3159_v28 }
 0xa55   :  { %v2589_v4 = vsub.f32 %v2557_v22, %v2583_v36 }
 0xa56   :  { %v3161_v46 = vpop.eup %3160  ;;  %v2590_v5 = vsub.f32 %v2558_v18, %v2585_v15 }
 0xa57   :  { %2593 = vst.msk [vmem:[%s4020_s10 + $0x8] sm:$0xff] %vm2132_vm6, %v2589_v4  ;;  %v2587_v57 = vmul.f32 0.6931472, %v3161_v46 }
 0xa58   :  { %2594 = vst.msk [vmem:[%s4020_s10 + $0x10] sm:$0xff] %vm2132_vm6, %v2590_v5 }
 0xa59   :  { %v2591_v27 = vsub.f32 %v2559_v16, %v2587_v57 }
 0xa5b   :  { %2595 = vst.msk [vmem:[%s4020_s10 + $0x18] sm:$0xff] %vm2132_vm6, %v2591_v27 }

</bundles_post_ra>
